<compile_context>
chip_gen: v5e
topology: v5e:2x2
jax: 0.10.0
libtpu: 0.0.40
codegen_flags: <defaults>
</compile_context>

<pallas_src>
import functools
import math

import jax
import jax.numpy as jnp
import numpy as np
from jax.experimental import pallas as pl
from jax.experimental.pallas import tpu as pltpu

_BIG = 1e30          # masked-score magnitude; finite so padded rows never NaN
_NEG_BIG = -_BIG


# --------------------------------------------------------------------------- #
# Kernel
# --------------------------------------------------------------------------- #
def _fused_gcn_gat_kernel(e_dst_ref, e_src_ref, hgcn_ref, hgat_ref,
                          a_gcn_ref, gap_ref, out_ref,
                          m_sc, acc_gat, acc_gcn, *, bf16_exp):
  """Grid = (target tiles [parallel], source tiles [arbitrary / reduction])."""
  k = pl.program_id(1)
  nk = pl.num_programs(1)

  @pl.when(k == 0)
  def _init():
    m_sc[...] = jnp.full_like(m_sc, _NEG_BIG)
    acc_gat[...] = jnp.zeros_like(acc_gat)
    acc_gcn[...] = jnp.zeros_like(acc_gcn)

  # ---- GCN:  acc_gcn[t, :] += sum_s normA[t, s] * (x W_gcn)[s, :]
  acc_gcn[...] += jnp.dot(a_gcn_ref[...], hgcn_ref[...],
                          preferred_element_type=jnp.float32)

  # ---- GAT: flash-style masked softmax over the source axis.
  s = e_dst_ref[...] + e_src_ref[...]                 # [tq,1] + [1,tk] -> [tq,tk]
  s = jnp.maximum(s, 0.2 * s)                         # LeakyReLU(0.2)
  s = s - gap_ref[...].astype(jnp.float32) * _BIG     # additive mask bias (gap==1 -> -inf)

  m_prev = m_sc[...]                                  # [tq, 1]
  m_new = jnp.maximum(m_prev, s.max(axis=-1, keepdims=True))
  rescale = jnp.exp(m_prev - m_new)                   # [tq, 1]
  if bf16_exp:                                        # bf16 EUP/VPU (v6e / v7x)
    p = jnp.exp((s - m_new).astype(jnp.bfloat16))
  else:                                               # v5e and older: f32 exp
    p = jnp.exp(s - m_new).astype(jnp.bfloat16)

  # NOTE: a fully-masked tile seen before any unmasked tile of a row yields
  # p == 1 garbage for that row; it is wiped by rescale == 0 on the first real
  # tile.  Every row (including padded rows) carries a self loop, so this is
  # always resolved before finalize.
  #
  # hgat's last padding column is all ones, so this single matmul also produces
  # the softmax row-sum in acc_gat[:, -1] (no separate cross-lane reduction);
  # the running denominator is rescaled together with the accumulator.
  acc_gat[...] = rescale * acc_gat[...] + jnp.dot(
      p, hgat_ref[...], preferred_element_type=jnp.float32)
  m_sc[...] = m_new

  @pl.when(k == nk - 1)
  def _finalize():
    acc = acc_gat[...]
    gat = acc * pl.reciprocal(acc[:, -1:], approx=True)
    fused = jnp.maximum(acc_gcn[...], 0.0) + jnp.maximum(gat, 0.0)
    out_ref[...] = fused.astype(out_ref.dtype)


# --------------------------------------------------------------------------- #
# Wrapper
# --------------------------------------------------------------------------- #
def _round_up(v, m):
  return (v + m - 1) // m * m


def _pad2(a, rows, cols):
  return jnp.pad(a, ((0, rows - a.shape[0]), (0, cols - a.shape[1])))


def _has_bf16_vector_units():
  """True on chips with bf16 EUP/VPU (v6e, v7x); False on v5e and older."""
  try:
    kind = jax.devices()[0].device_kind.lower()
  except Exception:
    return False
  return not any(t in kind for t in ("v2", "v3", "v4", "v5"))


def gcn_gat_node_features(x, edge_index, params, *, block_q=512, block_k=512,
                          interpret=False):
  """relu(GCN(x)) + relu(GAT(x))  ->  [N, hidden] node features."""
  x = x.astype(jnp.float32)
  n, _ = x.shape
  h = params["w_gcn"].shape[0]
  src, tgt = edge_index[0], edge_index[1]

  # Dense adjacency exactly as the PyTorch GCNConv builds it: A[src, tgt] = 1.
  a = jnp.zeros((n, n), jnp.float32).at[src, tgt].set(1.0)
  eye = jnp.eye(n, dtype=jnp.float32)
  a_tilde = a + eye
  d_inv_sqrt = a_tilde.sum(axis=1) ** -0.5
  a_gcn = d_inv_sqrt[:, None] * a_tilde * d_inv_sqrt[None, :]   # D^-1/2 (A+I) D^-1/2

  # GAT mask[target, source] = 1 for edges source->target plus self loops.
  a_msk = jnp.where((a.T + eye) > 0, 1.0, 0.0)

  # Hoisted projections (done once per node in the wrapper, streamed as bf16).
  h_gcn = x @ params["w_gcn"].T.astype(jnp.float32)             # [N, H]
  h_gat = x @ params["w1"].T.astype(jnp.float32)                # [N, H]  W1 x_s values
  e_src = h_gat @ params["a_t"].astype(jnp.float32)             # [N]  a_t . W1 x_s
  e_dst = (x @ params["w2"].T.astype(jnp.float32)) @ params["a_s"].astype(jnp.float32)

  # Tiling: nodes pad to the tile grid; hidden pads to a lane-dense width with
  # at least one spare column that holds the softmax row-sum "ones" column.
  n_128 = _round_up(n, 128)
  block_q = min(block_q, n_128)
  block_k = min(block_k, n_128)
  if n_128 // block_q < 2 and n_128 >= 256:        # v7x: keep both TCs busy
    block_q = (n_128 // 2) // 128 * 128
  n_p = _round_up(n, math.lcm(block_q, block_k))
  h_p = _round_up(h + 1, 128)

  a_gcn_p = _pad2(a_gcn, n_p, n_p).astype(jnp.bfloat16)
  # Padded target rows get a self loop so their (discarded) softmax stays finite.
  mask_p = jnp.maximum(_pad2(a_msk, n_p, n_p), jnp.eye(n_p, dtype=jnp.float32))
  gap_p = (1.0 - mask_p).astype(jnp.int8)          # 1 where NOT an edge
  h_gcn_p = _pad2(h_gcn, n_p, h_p).astype(jnp.bfloat16)
  h_gat_p = _pad2(h_gat, n_p, h_p).at[:, h_p - 1].set(1.0).astype(jnp.bfloat16)
  e_dst_p = jnp.pad(e_dst, (0, n_p - n)).reshape(n_p, 1).astype(jnp.float32)
  e_src_p = jnp.pad(e_src, (0, n_p - n)).reshape(1, n_p).astype(jnp.float32)

  grid = (n_p // block_q, n_p // block_k)
  kernel = functools.partial(_fused_gcn_gat_kernel,
                             bf16_exp=_has_bf16_vector_units())

  out = pl.pallas_call(
      kernel,
      out_shape=jax.ShapeDtypeStruct((n_p, h_p), jnp.float32),
      grid_spec=pltpu.PrefetchScalarGridSpec(
          num_scalar_prefetch=0,
          grid=grid,
          in_specs=[
              pl.BlockSpec((block_q, 1), lambda i, k: (i, 0)),        # e_dst (targets)
              pl.BlockSpec((1, block_k), lambda i, k: (0, k)),        # e_src (sources)
              pl.BlockSpec((block_k, h_p), lambda i, k: (k, 0)),      # h_gcn source tile
              pl.BlockSpec((block_k, h_p), lambda i, k: (k, 0)),      # h_gat source tile
              pl.BlockSpec((block_q, block_k), lambda i, k: (i, k)),  # normalized A (GCN)
              pl.BlockSpec((block_q, block_k), lambda i, k: (i, k)),  # int8 non-edge mask
          ],
          out_specs=pl.BlockSpec((block_q, h_p), lambda i, k: (i, 0)),
          scratch_shapes=[
              pltpu.VMEM((block_q, 1), jnp.float32),     # running max
              pltpu.VMEM((block_q, h_p), jnp.float32),   # GAT acc (+ row-sum column)
              pltpu.VMEM((block_q, h_p), jnp.float32),   # GCN acc
          ]),
      compiler_params=pltpu.CompilerParams(
          dimension_semantics=("parallel", "arbitrary"),
          vmem_limit_bytes=48 * 1024 * 1024),
      interpret=interpret,
  )(e_dst_p, e_src_p, h_gcn_p, h_gat_p, a_gcn_p, gap_p)

  return out[:n, :h]


def gcn_gat_forward(x, edge_index, params, **kwargs):
  """Full GCN_GAT forward; returns shape [1], like the PyTorch module."""
  fused = gcn_gat_node_features(x, edge_index, params, **kwargs)
  y = fused @ params["w_lin"].T + params["b_lin"]     # tiny final linear, wrapper side
  return y.sum(axis=0)                                # [1]


# --------------------------------------------------------------------------- #
# Pure-JAX reference (dense formulation of the PyTorch module)
# --------------------------------------------------------------------------- #
def reference_node_features(x, edge_index, params):
  n = x.shape[0]
  src, tgt = edge_index[0], edge_index[1]
  a = jnp.zeros((n, n), jnp.float32).at[src, tgt].set(1.0)
  eye = jnp.eye(n, dtype=jnp.float32)
  a_tilde = a + eye
  d_inv_sqrt = a_tilde.sum(axis=1) ** -0.5
  out1 = (d_inv_sqrt[:, None] * a_tilde * d_inv_sqrt[None, :]) @ x
  out1 = jax.nn.relu(out1 @ params["w_gcn"].T)

  h1 = x @ params["w1"].T
  h2 = x @ params["w2"].T
  e_src = h1 @ params["a_t"]
  e_dst = h2 @ params["a_s"]
  s = e_dst[:, None] + e_src[None, :]
  s = jnp.where(s > 0, s, 0.2 * s)
  mask = (a.T + eye) > 0
  s = jnp.where(mask, s, -jnp.inf)
  p = jax.nn.softmax(s, axis=-1)
  out2 = jax.nn.relu(p @ h1)
  return out1 + out2


def init_params(key, node_dim, hidden_dim):
  ks = jax.random.split(key, 7)

  def glorot(k, shape):
    fan_out, fan_in = shape
    lim = (6.0 / (fan_in + fan_out)) ** 0.5
    return jax.random.uniform(k, shape, jnp.float32, -lim, lim)

  return {
      "w_gcn": glorot(ks[0], (hidden_dim, node_dim)),   # nn.Linear layout [out, in]
      "w1": glorot(ks[1], (hidden_dim, node_dim)),
      "w2": glorot(ks[2], (hidden_dim, node_dim)),
      "a_s": jax.random.normal(ks[3], (hidden_dim,), jnp.float32) * 0.2,
      "a_t": jax.random.normal(ks[4], (hidden_dim,), jnp.float32) * 0.2,
      "w_lin": glorot(ks[5], (1, hidden_dim)),
      "b_lin": jax.random.normal(ks[6], (1,), jnp.float32) * 0.1,
  }


if __name__ == "__main__":
  key = jax.random.PRNGKey(0)
  num_nodes, node_dim, hidden_dim = 256, 48, 64

  k_x, k_p = jax.random.split(key)
  x = jax.random.normal(k_x, (num_nodes, node_dim), jnp.float32)
  params = init_params(k_p, node_dim, hidden_dim)

  # Deterministic, duplicate-free, self-loop-free directed edge list.
  nodes = np.arange(num_nodes)
  offsets = [1, 2, 7, 31, 101]
  src = np.concatenate([nodes for _ in offsets])
  tgt = np.concatenate([(nodes + o) % num_nodes for o in offsets])
  edge_index = jnp.asarray(np.stack([src, tgt], axis=0), dtype=jnp.int32)

  # Full module forward (scalar output, shape [1]).
  out = gcn_gat_forward(x, edge_index, params)
  out = jax.block_until_ready(out)

  # Correctness check of the fused node features against a pure-JAX reference
  # (loose tolerance: adjacency / mask / softmax streams run in bf16 / int8).
  fused = jax.block_until_ready(gcn_gat_node_features(x, edge_index, params))
  ref = reference_node_features(x, edge_index, params)
  np.testing.assert_allclose(np.asarray(fused), np.asarray(ref),
                             rtol=5e-2, atol=5e-2)

  print("KERNEL_OK")
</pallas_src>

<mosaic_0001>
module attributes {stable_mosaic.version = 11 : i64} {
  func.func @_fused_gcn_gat_kernel(%arg0: i32, %arg1: i32, %arg2: memref<128x1xf32, #tpu.memory_space<vmem>>, %arg3: memref<1x256xf32, #tpu.memory_space<vmem>>, %arg4: memref<256x128xbf16, #tpu.memory_space<vmem>>, %arg5: memref<256x128xbf16, #tpu.memory_space<vmem>>, %arg6: memref<128x256xbf16, #tpu.memory_space<vmem>>, %arg7: memref<128x256xi8, #tpu.memory_space<vmem>>, %arg8: memref<128x128xf32, #tpu.memory_space<vmem>>, %arg9: memref<128x1xf32, #tpu.memory_space<vmem>>, %arg10: memref<128x128xf32, #tpu.memory_space<vmem>>, %arg11: memref<128x128xf32, #tpu.memory_space<vmem>>) attributes {dimension_semantics = [#tpu.dimension_semantics<parallel>, #tpu.dimension_semantics<arbitrary>], iteration_bounds = array<i64: 2, 1>, scalar_prefetch = 0 : i64, scratch_operands = 3 : i64, tpu.core_type = #tpu.core_type<tc>, window_params = [{transform_indices = @transform_0, window_bounds = array<i64: 128, 1>}, {transform_indices = @transform_1, window_bounds = array<i64: 1, 256>}, {transform_indices = @transform_2, window_bounds = array<i64: 256, 128>}, {transform_indices = @transform_3, window_bounds = array<i64: 256, 128>}, {transform_indices = @transform_4, window_bounds = array<i64: 128, 256>}, {transform_indices = @transform_5, window_bounds = array<i64: 128, 256>}, {transform_indices = @transform_6, window_bounds = array<i64: 128, 128>}]} {
    %c0_i32 = arith.constant 0 : i32
    %0 = arith.cmpi eq, %arg1, %c0_i32 : i32
    %1 = arith.extui %0 : i1 to i32
    %c0_i32_0 = arith.constant 0 : i32
    %2 = arith.cmpi ne, %1, %c0_i32_0 : i32
    scf.if %2 {
      %cst_30 = arith.constant -1.000000e+30 : f32
      %43 = vector.broadcast %cst_30 : f32 to vector<128x1xf32>
      %c0_31 = arith.constant 0 : index
      %c0_32 = arith.constant 0 : index
      %44 = vector.load %arg9[%c0_31, %c0_32] : memref<128x1xf32, #tpu.memory_space<vmem>>, vector<128x1xf32>
      tpu.vector_store %arg9[%c0_31, %c0_32], %43 {strides = array<i32>} : memref<128x1xf32, #tpu.memory_space<vmem>>, vector<128x1xf32>,
      %cst_33 = arith.constant 0.000000e+00 : f32
      %45 = vector.broadcast %cst_33 : f32 to vector<128x128xf32>
      %c0_34 = arith.constant 0 : index
      %c0_35 = arith.constant 0 : index
      %46 = vector.load %arg10[%c0_34, %c0_35] : memref<128x128xf32, #tpu.memory_space<vmem>>, vector<128x128xf32>
      tpu.vector_store %arg10[%c0_34, %c0_35], %45 {strides = array<i32>} : memref<128x128xf32, #tpu.memory_space<vmem>>, vector<128x128xf32>,
      %cst_36 = arith.constant 0.000000e+00 : f32
      %47 = vector.broadcast %cst_36 : f32 to vector<128x128xf32>
      %c0_37 = arith.constant 0 : index
      %c0_38 = arith.constant 0 : index
      %48 = vector.load %arg11[%c0_37, %c0_38] : memref<128x128xf32, #tpu.memory_space<vmem>>, vector<128x128xf32>
      tpu.vector_store %arg11[%c0_37, %c0_38], %47 {strides = array<i32>} : memref<128x128xf32, #tpu.memory_space<vmem>>, vector<128x128xf32>,
    } else {
    }
    %c0 = arith.constant 0 : index
    %c0_1 = arith.constant 0 : index
    %3 = vector.load %arg11[%c0, %c0_1] : memref<128x128xf32, #tpu.memory_space<vmem>>, vector<128x128xf32>
    %c0_2 = arith.constant 0 : index
    %c0_3 = arith.constant 0 : index
    %4 = vector.load %arg6[%c0_2, %c0_3] : memref<128x256xbf16, #tpu.memory_space<vmem>>, vector<128x256xbf16>
    %c0_4 = arith.constant 0 : index
    %c0_5 = arith.constant 0 : index
    %5 = vector.load %arg4[%c0_4, %c0_5] : memref<256x128xbf16, #tpu.memory_space<vmem>>, vector<256x128xbf16>
    %cst = arith.constant dense<0.000000e+00> : vector<128x128xf32>
    %6 = tpu.matmul %4, %5, %cst {dimension_numbers = #tpu.dot_dimension_numbers<[1], [0], [0], [1], [0, 0, 1, 1], [], []>} : vector<128x256xbf16>, vector<256x128xbf16>, vector<128x128xf32> -> vector<128x128xf32>
    %7 = arith.addf %3, %6 : vector<128x128xf32>
    %c0_6 = arith.constant 0 : index
    %c0_7 = arith.constant 0 : index
    %8 = vector.load %arg11[%c0_6, %c0_7] : memref<128x128xf32, #tpu.memory_space<vmem>>, vector<128x128xf32>
    tpu.vector_store %arg11[%c0_6, %c0_7], %7 {strides = array<i32>} : memref<128x128xf32, #tpu.memory_space<vmem>>, vector<128x128xf32>,
    %c0_8 = arith.constant 0 : index
    %c0_9 = arith.constant 0 : index
    %9 = vector.load %arg2[%c0_8, %c0_9] : memref<128x1xf32, #tpu.memory_space<vmem>>, vector<128x1xf32>
    %c0_10 = arith.constant 0 : index
    %c0_11 = arith.constant 0 : index
    %10 = vector.load %arg3[%c0_10, %c0_11] : memref<1x256xf32, #tpu.memory_space<vmem>>, vector<1x256xf32>
    %11 = vector.broadcast %9 : vector<128x1xf32> to vector<128x256xf32>
    %12 = vector.broadcast %10 : vector<1x256xf32> to vector<128x256xf32>
    %13 = arith.addf %11, %12 : vector<128x256xf32>
    %cst_12 = arith.constant 2.000000e-01 : f32
    %14 = vector.broadcast %cst_12 : f32 to vector<128x256xf32>
    %15 = arith.mulf %14, %13 : vector<128x256xf32>
    %16 = arith.maximumf %13, %15 : vector<128x256xf32>
    %c0_13 = arith.constant 0 : index
    %c0_14 = arith.constant 0 : index
    %17 = vector.load %arg7[%c0_13, %c0_14] : memref<128x256xi8, #tpu.memory_space<vmem>>, vector<128x256xi8>
    %18 = arith.sitofp %17 : vector<128x256xi8> to vector<128x256xf32>
    %cst_15 = arith.constant 1.000000e+30 : f32
    %19 = vector.broadcast %cst_15 : f32 to vector<128x256xf32>
    %20 = arith.mulf %18, %19 : vector<128x256xf32>
    %21 = arith.subf %16, %20 : vector<128x256xf32>
    %c0_16 = arith.constant 0 : index
    %c0_17 = arith.constant 0 : index
    %22 = vector.load %arg9[%c0_16, %c0_17] : memref<128x1xf32, #tpu.memory_space<vmem>>, vector<128x1xf32>
    %cst_18 = arith.constant dense<0xFF800000> : vector<128xf32>
    %23 = vector.multi_reduction <maximumf>, %21, %cst_18 [1] : vector<128x256xf32> to vector<128xf32>
    %24 = vector.shape_cast %23 : vector<128xf32> to vector<128x1xf32>
    %25 = arith.maximumf %22, %24 : vector<128x1xf32>
    %26 = arith.subf %22, %25 : vector<128x1xf32>
    %27 = math.exp %26 : vector<128x1xf32>
    %28 = vector.broadcast %25 : vector<128x1xf32> to vector<128x256xf32>
    %29 = arith.subf %21, %28 : vector<128x256xf32>
    %30 = arith.truncf %29 : vector<128x256xf32> to vector<128x256xbf16>
    %31 = math.exp %30 : vector<128x256xbf16>
    %c0_19 = arith.constant 0 : index
    %c0_20 = arith.constant 0 : index
    %32 = vector.load %arg10[%c0_19, %c0_20] : memref<128x128xf32, #tpu.memory_space<vmem>>, vector<128x128xf32>
    %33 = vector.broadcast %27 : vector<128x1xf32> to vector<128x128xf32>
    %34 = arith.mulf %33, %32 : vector<128x128xf32>
    %c0_21 = arith.constant 0 : index
    %c0_22 = arith.constant 0 : index
    %35 = vector.load %arg5[%c0_21, %c0_22] : memref<256x128xbf16, #tpu.memory_space<vmem>>, vector<256x128xbf16>
    %cst_23 = arith.constant dense<0.000000e+00> : vector<128x128xf32>
    %36 = tpu.matmul %31, %35, %cst_23 {dimension_numbers = #tpu.dot_dimension_numbers<[1], [0], [0], [1], [0, 0, 1, 1], [], []>} : vector<128x256xbf16>, vector<256x128xbf16>, vector<128x128xf32> -> vector<128x128xf32>
    %37 = arith.addf %34, %36 : vector<128x128xf32>
    %c0_24 = arith.constant 0 : index
    %c0_25 = arith.constant 0 : index
    %38 = vector.load %arg10[%c0_24, %c0_25] : memref<128x128xf32, #tpu.memory_space<vmem>>, vector<128x128xf32>
    tpu.vector_store %arg10[%c0_24, %c0_25], %37 {strides = array<i32>} : memref<128x128xf32, #tpu.memory_space<vmem>>, vector<128x128xf32>,
    %c0_26 = arith.constant 0 : index
    %c0_27 = arith.constant 0 : index
    %39 = vector.load %arg9[%c0_26, %c0_27] : memref<128x1xf32, #tpu.memory_space<vmem>>, vector<128x1xf32>
    tpu.vector_store %arg9[%c0_26, %c0_27], %25 {strides = array<i32>} : memref<128x1xf32, #tpu.memory_space<vmem>>, vector<128x1xf32>,
    %c0_i32_28 = arith.constant 0 : i32
    %40 = arith.cmpi eq, %arg1, %c0_i32_28 : i32
    %41 = arith.extui %40 : i1 to i32
    %c0_i32_29 = arith.constant 0 : i32
    %42 = arith.cmpi ne, %41, %c0_i32_29 : i32
    scf.if %42 {
      %c0_30 = arith.constant 0 : index
      %c0_31 = arith.constant 0 : index
      %43 = vector.load %arg10[%c0_30, %c0_31] : memref<128x128xf32, #tpu.memory_space<vmem>>, vector<128x128xf32>
      %44 = vector.extract_strided_slice %43 {offsets = [0, 127], sizes = [128, 1], strides = [1, 1]} : vector<128x128xf32> to vector<128x1xf32>
      %45 = tpu.reciprocal %44 {approx = true} : vector<128x1xf32> -> vector<128x1xf32>
      %46 = vector.broadcast %45 : vector<128x1xf32> to vector<128x128xf32>
      %47 = arith.mulf %43, %46 : vector<128x128xf32>
      %c0_32 = arith.constant 0 : index
      %c0_33 = arith.constant 0 : index
      %48 = vector.load %arg11[%c0_32, %c0_33] : memref<128x128xf32, #tpu.memory_space<vmem>>, vector<128x128xf32>
      %cst_34 = arith.constant 0.000000e+00 : f32
      %49 = vector.broadcast %cst_34 : f32 to vector<128x128xf32>
      %50 = arith.maximumf %48, %49 : vector<128x128xf32>
      %cst_35 = arith.constant 0.000000e+00 : f32
      %51 = vector.broadcast %cst_35 : f32 to vector<128x128xf32>
      %52 = arith.maximumf %47, %51 : vector<128x128xf32>
      %53 = arith.addf %50, %52 : vector<128x128xf32>
      %c0_36 = arith.constant 0 : index
      %c0_37 = arith.constant 0 : index
      %54 = vector.load %arg8[%c0_36, %c0_37] : memref<128x128xf32, #tpu.memory_space<vmem>>, vector<128x128xf32>
      tpu.vector_store %arg8[%c0_36, %c0_37], %53 {strides = array<i32>} : memref<128x128xf32, #tpu.memory_space<vmem>>, vector<128x128xf32>,
    } else {
    }
    return
  }
  func.func @transform_0(%arg0: i32, %arg1: i32) -> (i32, i32) {
    %c0_i32 = arith.constant 0 : i32
    %c0_i32_0 = arith.constant 0 : i32
    return %arg0, %c0_i32 : i32, i32
  }
  func.func @transform_1(%arg0: i32, %arg1: i32) -> (i32, i32) {
    %c0_i32 = arith.constant 0 : i32
    %c0_i32_0 = arith.constant 0 : i32
    return %c0_i32, %arg1 : i32, i32
  }
  func.func @transform_2(%arg0: i32, %arg1: i32) -> (i32, i32) {
    %c0_i32 = arith.constant 0 : i32
    %c0_i32_0 = arith.constant 0 : i32
    return %arg1, %c0_i32 : i32, i32
  }
  func.func @transform_3(%arg0: i32, %arg1: i32) -> (i32, i32) {
    %c0_i32 = arith.constant 0 : i32
    %c0_i32_0 = arith.constant 0 : i32
    return %arg1, %c0_i32 : i32, i32
  }
  func.func @transform_4(%arg0: i32, %arg1: i32) -> (i32, i32) {
    %c0_i32 = arith.constant 0 : i32
    return %arg0, %arg1 : i32, i32
  }
  func.func @transform_5(%arg0: i32, %arg1: i32) -> (i32, i32) {
    %c0_i32 = arith.constant 0 : i32
    return %arg0, %arg1 : i32, i32
  }
  func.func @transform_6(%arg0: i32, %arg1: i32) -> (i32, i32) {
    %c0_i32 = arith.constant 0 : i32
    %c0_i32_0 = arith.constant 0 : i32
    return %arg0, %c0_i32 : i32, i32
  }
}

</mosaic_0001>

<bundles_post_ra>
// kernel: tpu_custom_call.1
= control target key start
LH: loop header
LB: loop body
LE: loop exit
PB: predicated region body
PF: predicated region fallthrough
CT: control target
= control target key end

     0   :  { %s3824_s0 = inlined_call_operand.vmem [shape: f32[256,1], index: 0, kind: input, shape index: {}]   ;;  %s3825_s1 = inlined_call_operand.vmem [shape: f32[1,256], index: 1, kind: input, shape index: {}]   ;;  %s3826_s2 = inlined_call_operand.hbm [shape: bf16[256,128], index: 2, kind: input, shape index: {}]   ;;  %s3827_s3 = inlined_call_operand.hbm [shape: bf16[256,128], index: 3, kind: input, shape index: {}]   ;;  %s3828_s4 = inlined_call_operand.vmem [shape: bf16[256,256], index: 4, kind: input, shape index: {}]   ;;  %s3829_s5 = inlined_call_operand.hbm [shape: s8[256,256], index: 5, kind: input, shape index: {}]   ;;  %s3830_s6 = inlined_call_operand.hbm [shape: f32[256,128], index: 6, kind: output, shape index: {}]  }
   0x1   :  { %3847 = sst [smem:[#allocation32_spill]] %s3826_s2 }
   0x2   :  { %3848 = sst [smem:[#allocation33_spill]] %s3827_s3 }
   0x3   :  { %11 = vsyncpa [#allocation6], 0 }
   0x4   :  { %12 = vsyncpa [#allocation9], 0 }
   0x5   :  { %13 = vsyncpa [#allocation7], 0 }
   0x6   :  { %15 = vsyncpa [#allocation7 + $0x1], 0  ;;  %s3035_s21 = smov 0   ;;  %s3037_s22 = smov 0  }
   0x7   :  { %s3039_s23 = smov 0   ;;  %s3041_s24 = smov 0  }
   0x8   :  { %s3043_s25 = smov 0   ;;  %s3045_s26 = smov 0  }
   0x9 LB: > { %s3066_s27 = sadd.s32 4294967295, %s2987_s26   ;;  %s2312_s28 = sadd.s32 4294967294, %s2987_s26   ;;  %s2987_s26 = sphi %s3045_s26, %s21_s26   ;;  %s2983_s25 = sphi %s3043_s25, %s3901_s25   ;;  %s2979_s24 = sphi %s3041_s24, %s3900_s24   ;;  %s2975_s23 = sphi %s3039_s23, %s3899_s23   ;;  %s2971_s22 = sphi %s3037_s22, %s3898_s22   ;;  %s2967_s21 = sphi %s3035_s21, %s3897_s21  }
   0xa   : > { %p187_p0 = scmp.ne.s32.totalorder %s2971_s22, %s2967_s21  ;;  %p188_p1 = scmp.eq.s32.totalorder %s3066_s27, 0 }
   0xb   : > { %p211_p2 = scmp.eq.s32.totalorder %s3066_s27, 1  ;;  %p217_p3 = scmp.eq.s32.totalorder %s2312_s28, 1 }
   0xc   : > { %p3075_p4 = por %p188_p1, %p187_p0  ;;  %p2313_p5 = scmp.ge.s32.totalorder %s2987_s26, 1 }
   0xd   : > { %p3080_p6 = por %p217_p3, %p187_p0  ;;  %p224_p7 = scmp.lt.s32.totalorder %s2987_s26, 3 }
   0xe   : > { %s3852_s2 = sld [smem:[#allocation32_spill]]  ;;  %s2989_s11 = smov [#allocation5]  }
   0xf   : > { %s3850_s30 = scalar_select %p3080_p6, 1, 0 }
  0x10   : > { %p3088_p8 = pnand %p2313_p5, %p224_p7  ;;  %s248_s12 = sshll.u32 %s2989_s11, 4  ;;  %s249_s12 = int_to_ptr.vmem [resolvable:$true] %s248_s12 }
  0x11   : > { %3851 = sst [smem:[#allocation16_spill]] %s3850_s30  ;;  %p2317_p11 = scmp.ge.s32.totalorder %s2987_s26, 2 }
  0x12   : > { %p2593_p9 = pneg %p3088_p8  ;;  %s3854_s3 = sld [smem:[#allocation33_spill]] }
  0x13   : > { %s2990_s16 = smov 64   ;;  %s2991_s17 = smov 4  }
  0x14   : > { %s246_s9 = sshll.u32 %s3852_s2, 4  ;;  %p2594_p10 = pnand %p2593_p9, %p188_p1  ;;  %s247_s9 = int_to_ptr.hbm [resolvable:$true] %s246_s9 }
  0x15   : > { %s2992_s18 = smov [#allocation8]   ;;  %s33_s20 = sadd.s32 1, %s2983_s25 }
  0x16   : > { %2596 = dma.hbm_to_vmem [thread:$0]  (!%p2594_p10), %s247_s9, 2048, %s249_s12, [#allocation6], %s2990_s16, %s2990_s16, %s2991_s17  }
  0x17   : > { %s265_s19 = sshll.u32 %s2992_s18, 4  ;;  %s174_s28 = sadd.s32 1, %s2975_s23  ;;  %s266_s19 = int_to_ptr.vmem [resolvable:$true] %s265_s19 }
  0x18   : > { %s263_s15 = sshll.u32 %s3854_s3, 4  ;;  %p35_p12 = scmp.ge.s32.totalorder %s33_s20, 2  ;;  %s264_s15 = int_to_ptr.hbm [resolvable:$true] %s263_s15 }
  0x19   : > { %2599 = dma.hbm_to_vmem [thread:$0]  (!%p2594_p10), %s264_s15, 2048, %s266_s19, [#allocation9], %s2990_s16, %s2990_s16, %s2991_s17  }
  0x1a   : > { %p181_p13 = scmp.ne.s32.totalorder %s2975_s23, %s2971_s22  ;;  %p182_p0 = scmp.eq.s32.totalorder %s2987_s26, 0 }
  0x1b   : > { %p2610_p3 = scmp.lt.s32.totalorder %s2987_s26, 2  ;;  %s3903_s20 = smov (%p35_p12, %s33_s20), 0 }
  0x1c   : > { %3855 = sst [smem:[#allocation17_spill]] %s3903_s20  ;;  %p3108_p5 = por %p182_p0, %p181_p13 }
  0x1d   : > { %p3114_p7 = por %p211_p2, %p181_p13  ;;  %s169_s9 = ssub.s32 %s2983_s25, %s3903_s20 }
  0x1e   : > { %s303_s11 = sand.u32 1, %s2987_s26   ;;  %p172_p9 = scmp.eq.s32.totalorder %s169_s9, 0 }
  0x1f   : > { %s305_s12 = sand.u32 1, %s2975_s23   ;;  %s2530_s13 = sshll.u32 %s2983_s25, 6 }
  0x20   : > { %s3124_s14 = scalar_select %p172_p9, %s2975_s23, %s174_s28  }
  0x21   : > { %s2318_s15 = sshll.u32 %s305_s12, 6  ;;  %s315_s18 = scalar_lea.hbm %s3829_s5, %s2530_s13 }
  0x22   : > { %s316_s19 = sshll.u32 %s315_s18, 4  ;;  %s307_s2 = scalar_lea.vmem [#allocation10], %s2318_s15  ;;  %s317_s19 = int_to_ptr.hbm [resolvable:$true] %s316_s19 }
  0x23   : > { %s318_s3 = sshll.u32 %s307_s2, 4  ;;  %p2601_p2 = pnand %p2610_p3, %p3108_p5  ;;  %s319_s3 = int_to_ptr.vmem [resolvable:$true] %s318_s3 }
  0x24   : > { %s304_s20 = scalar_lea.sflag [#allocation6], %s303_s11  ;;  %s2993_s30 = smov 256  }
  0x25   : > { %s2994_s9 = smov 16   ;;  %330 = sbr.rel (%p3088_p8) target bundleno = 954 (0x3ba), region = 44 }
  0x26   : > { %2603 = dma.hbm_to_vmem [thread:$0]  (!%p2601_p2), %s317_s19, 1024, %s319_s3, %s304_s20, %s2993_s30, %s2993_s30, %s2994_s9  }
  0x2a   : > { %2950 = dma.done.wait (%p188_p1), [#allocation6], 2048  }
  0x2b   : > { %2952 = vsyncadd (%p188_p1), [#allocation6], 4294965248 }
  0x2c   : > { %2954 = dma.done.wait (%p188_p1), [#allocation9], 2048  }
  0x2d   : > { %2956 = vsyncadd (%p188_p1), [#allocation9], 4294965248  ;;  %s342_s2 = sand.u32 1, %s3066_s27   ;;  %s3145_s3 = sand.u32 1, %s2971_s22  }
  0x2e   : > { %s2325_s30 = sshll.u32 %s3145_s3, 6  ;;  %s343_s10 = scalar_lea.sflag [#allocation6], %s342_s2 }
  0x2f   : > { %s3148_s20 = scalar_lea.vmem [#allocation10], %s2325_s30 }
  0x30   : > { %2958 = dma.done.wait (%p3075_p4), %s343_s10, 1024  }
  0x31   : > { %2960 = vsyncadd (%p3075_p4), %s343_s10, 4294966272  ;;  %s2327_s28 = sshll.u32 %s2979_s24, 4  ;;  %v2995_v0 = vmov 0   ;;  %v862_v14 = vld [vmem:[%s3825_s1] sm:$0x3]  ;;  %v3182_v16 = vld [vmem:[%s3148_s20 + $0x10] sm:$0xff] }
  0x32   : > { %2674 = vset.pattern.permute.xlu1 %v2995_v0  ;;  %2673 = vset.pattern.permute.xlu0 %v2995_v0  ;;  %p396_p1 = scmp.lt.s32.totalorder %s2327_s28, 31  ;;  %v3185_v17 = vld [vmem:[%s3148_s20 + $0x18] sm:$0xff]  ;;  %v3187_v18 = vperm.slane %v862_v14, 0  ;;  %v3189_v19 = vperm.slane %v862_v14, 1  ;;  %v1044_v20 = vld [vmem:[%s3148_s20] sm:$0xff]  ;;  %v1045_v21 = vld [vmem:[%s3148_s20 + $0x8] sm:$0xff]  ;;  %v1060_v24 = vunpack.c.0.s8 %v3182_v16  ;;  %v1066_v48 = vunpack.c.3.s8 %v3182_v16 }
  0x33   : > { %2675 = vset.pattern.permute.xlu2 %v2995_v0  ;;  %v1061_v25 = vunpack.c.0.s8 %v3185_v17  ;;  %v1056_v26 = vunpack.c.2.s8 %v1044_v20  ;;  %v1057_v27 = vunpack.c.2.s8 %v1045_v21  ;;  %v1052_v28 = vunpack.c.0.s8 %v1044_v20  ;;  %s2326_s18 = sshll.u32 %s3145_s3, 7  ;;  %s2580_s9 = sshll.u32 %s2979_s24, 7 }
  0x34   : > { %s3905_s28 = smov (!%p396_p1, %s2327_s28), 31  ;;  %v1053_v29 = vunpack.c.0.s8 %v1045_v21  ;;  %v1092_v32 = vcvt.s32.f32 %v1060_v24  ;;  %v1058_v34 = vunpack.c.3.s8 %v1044_v20  ;;  %v1059_v35 = vunpack.c.3.s8 %v1045_v21  ;;  %s3717_s19 = scalar_lea.vmem [#allocation11], %s2326_s18 }
  0x35   : > { %s2328_s27 = sshll.u32 %s3905_s28, 3  ;;  %v1093_v33 = vcvt.s32.f32 %v1061_v25  ;;  %v1088_v36 = vcvt.s32.f32 %v1056_v26  ;;  %v1089_v37 = vcvt.s32.f32 %v1057_v27  ;;  %v1084_v38 = vcvt.s32.f32 %v1052_v28  ;;  %s2158_s10 = scalar_lea.hbm %s3830_s6, %s2580_s9 }
  0x36   : > { %s3163_s12 = scalar_lea.vmem %s3824_s0, %s2328_s27  ;;  %v1085_v39 = vcvt.s32.f32 %v1053_v29  ;;  %v1054_v40 = vunpack.c.1.s8 %v1044_v20  ;;  %v1055_v41 = vunpack.c.1.s8 %v1045_v21  ;;  %v1124_v44 = vmul.f32 1e+30, %v1092_v32  ;;  %s3572_s17 = scalar_lea.vmem %s3828_s4, %s2328_s27 }
  0x37   : > { %v848_v1 = vld [vmem:[%s3163_s12 + $0x10] sm:$0xff]  ;;  %v846_v2 = vld [vmem:[%s3163_s12] sm:$0xff]  ;;  %v849_v4 = vld [vmem:[%s3163_s12 + $0x18] sm:$0xff]  ;;  %v1125_v45 = vmul.f32 1e+30, %v1093_v33  ;;  %v1090_v46 = vcvt.s32.f32 %v1058_v34  ;;  %v1091_v47 = vcvt.s32.f32 %v1059_v35  ;;  %v1067_v53 = vunpack.c.3.s8 %v3185_v17  ;;  %s2161_s28 = sshll.u32 %s2158_s10, 4  ;;  %s2162_s28 = int_to_ptr.hbm [resolvable:$true] %s2161_s28 }
  0x38   : > { %875 = vperm.xlu1 %2674, %v848_v1   ;;  %865 = vperm.xlu0 %2673, %v846_v2   ;;  %v850_v3 = vld [vmem:[%s3163_s12 + $0x20] sm:$0xff]  ;;  %v847_v5 = vld [vmem:[%s3163_s12 + $0x8] sm:$0xff]  ;;  %v853_v7 = vld [vmem:[%s3163_s12 + $0x38] sm:$0xff]  ;;  %v1120_v49 = vmul.f32 1e+30, %v1088_v36  ;;  %v1086_v51 = vcvt.s32.f32 %v1054_v40  ;;  %v1087_v52 = vcvt.s32.f32 %v1055_v41  ;;  %v1064_v54 = vunpack.c.2.s8 %v3182_v16  ;;  %s2147_s24 = scalar_lea.sflag [#allocation7], %s3145_s3 }
  0x39   : > { %885 = vperm.xlu2 %2675, %v850_v3   ;;  %v851_v6 = vld [vmem:[%s3163_s12 + $0x28] sm:$0xff]  ;;  %v852_v8 = vld [vmem:[%s3163_s12 + $0x30] sm:$0xff]  ;;  %v854_v10 = vld [vmem:[%s3163_s12 + $0x40] sm:$0xff]  ;;  %v1121_v50 = vmul.f32 1e+30, %v1089_v37  ;;  %v1098_v63 = vcvt.s32.f32 %v1066_v48  ;;  %v1065_v0 = vunpack.c.2.s8 %v3185_v17  ;;  %v1062_v29 = vunpack.c.1.s8 %v3182_v16  ;;  %s2911_s27 = sshra.s32 %s2162_s28, 4  ;;  %s2912_s27 = int_to_ptr.hbm [resolvable:$true] %s2911_s27 }
  0x3a   : > { %v856_v9 = vld [vmem:[%s3163_s12 + $0x50] sm:$0xff]  ;;  %v857_v11 = vld [vmem:[%s3163_s12 + $0x58] sm:$0xff]  ;;  %v855_v12 = vld [vmem:[%s3163_s12 + $0x48] sm:$0xff]  ;;  %v1116_v55 = vmul.f32 1e+30, %v1084_v38  ;;  %v1063_v34 = vunpack.c.1.s8 %v3185_v17  ;;  %vm427_vm0 = vcmask 7168   ;;  %p2918_p12 = scmp.lt.s32.totalorder %s2912_s27, %s3830_s6 }
  0x3b   : > { %v861_v13 = vld [vmem:[%s3163_s12 + $0x78] sm:$0xff]  ;;  %v1117_v56 = vmul.f32 1e+30, %v1085_v39  ;;  %v3204_v61 = vmul.f32 1e+30, %v1090_v46  ;;  %v3237_v33 = vld [vmem:[%s3148_s20 + $0x20] sm:$0xff]  ;;  %v1094_v48 = vcvt.s32.f32 %v1062_v29 }
  0x3c   : > { %v3206_v62 = vmul.f32 1e+30, %v1091_v47  ;;  %v3223_v25 = vmul.f32 1e+30, %v1098_v63  ;;  %v1068_v46 = vunpack.c.0.s8 %v3237_v33  ;;  %s2913_s7 = scalar_lea.hbm %s2912_s27, 128  ;;  %s2917_s29 = scalar_lea.hbm %s3830_s6, 256 }
  0x3d   : > { %p2914_p4 = scmp.ne.s32.totalorder %s2912_s27, %s2913_s7  ;;  %p2919_p13 = scmp.lt.s32.totalorder %s2917_s29, %s2913_s7 }
  0x3f   : > { %p2915_p8 = pnand %p2914_p4, %p3114_p7  ;;  %p2920_p0 = por %p2919_p13, %p2918_p12 }
  0x40   : > { %880 = vperm.xlu1 %2674, %v849_v4   ;;  %870 = vperm.xlu0 %2673, %v847_v5  }
  0x41   : > { %890 = vperm.xlu2 %2675, %v851_v6   ;;  %v1118_v6 = vmul.f32 1e+30, %v1086_v51  ;;  %p2916_p10 = pneg %p2915_p8 }
  0x43   : > { %p2921_p3 = pnand %p2920_p0, %p2916_p10 }
  0x48   : > { %900 = vperm.xlu1 %2674, %v853_v7   ;;  %895 = vperm.xlu0 %2673, %v852_v8   ;;  %v3213_v7 = vmul.f32 1e+30, %v1087_v52  ;;  %v1099_v8 = vcvt.s32.f32 %v1067_v53  ;;  %v1095_v52 = vcvt.s32.f32 %v1063_v34 }
  0x49   : > { %915 = vperm.xlu2 %2675, %v856_v9   ;;  %v1096_v9 = vcvt.s32.f32 %v1064_v54 }
  0x4a   : > { %v3225_v27 = vmul.f32 1e+30, %v1099_v8 }
  0x4b   : > { %v3227_v28 = vmul.f32 1e+30, %v1096_v9  ;;  %v1127_v9 = vmul.f32 1e+30, %v1095_v52 }
  0x50   : > { %905 = vperm.xlu1 %2674, %v854_v10   ;;  %920 = vperm.xlu0 %2673, %v857_v11  }
  0x58   : > { %910 = vperm.xlu1 %2674, %v855_v12   ;;  %940 = vperm.xlu0 %2673, %v861_v13  }
  0x93   : > { %v886_v15 = vpop.permute.xlu2 %885 }
  0x94   : > { %v956_v22 = vadd.f32 %v3187_v18, %v886_v15  ;;  %v957_v23 = vadd.f32 %v3189_v19, %v886_v15  ;;  %v1097_v15 = vcvt.s32.f32 %v1065_v0 }
  0x96   : > { %v988_v30 = vmul.f32 0.2, %v956_v22  ;;  %v989_v31 = vmul.f32 0.2, %v957_v23  ;;  %v3242_v38 = vmul.f32 1e+30, %v1097_v15 }
  0x98   : > { %v1020_v42 = vmax.f32 %v956_v22, %v988_v30  ;;  %v1021_v43 = vmax.f32 %v957_v23, %v989_v31 }
  0x9a   : > { %v3200_v57 = vsub.f32 %v1020_v42, %v1124_v44  ;;  %v3202_v58 = vsub.f32 %v1021_v43, %v1125_v45  ;;  %v3251_v44 = vld [vmem:[%s3148_s20 + $0x28] sm:$0xff] }
  0x9b   : > { %v891_v5 = vpop.permute.xlu2 %890  ;;  %v1073_v15 = vunpack.c.2.s8 %v3251_v44 }
  0x9c   : > { %v1208_v13 = vmax.f32 %v3200_v57, %v3202_v58  ;;  %v3218_v20 = vadd.f32 %v3187_v18, %v891_v5  ;;  %v3221_v21 = vadd.f32 %v3189_v19, %v891_v5 }
  0x9e   : > { %v990_v39 = vmul.f32 0.2, %v3218_v20  ;;  %v991_v16 = vmul.f32 0.2, %v3221_v21 }
  0xa0   : > { %v1022_v54 = vmax.f32 %v3218_v20, %v990_v39 }
  0xa3   : > { %v916_v47 = vpop.permute.xlu2 %915 }
  0xa4   : > { %v3262_v0 = vadd.f32 %v3187_v18, %v916_v47 }
  0xaa   : > { %v876_v59 = vpop.permute.xlu1 %875  ;;  %v866_v60 = vpop.permute.xlu0 %865 }
  0xab   : > { %v952_v1 = vadd.f32 %v3187_v18, %v876_v59  ;;  %v953_v2 = vadd.f32 %v3189_v19, %v876_v59  ;;  %v948_v3 = vadd.f32 %v3187_v18, %v866_v60  ;;  %v949_v4 = vadd.f32 %v3189_v19, %v866_v60 }
  0xad   : > { %v984_v10 = vmul.f32 0.2, %v952_v1  ;;  %v985_v11 = vmul.f32 0.2, %v953_v2  ;;  %v980_v12 = vmul.f32 0.2, %v948_v3 }
  0xae   : > { %v981_v14 = vmul.f32 0.2, %v949_v4 }
  0xaf   : > { %v1016_v22 = vmax.f32 %v952_v1, %v984_v10  ;;  %v1017_v23 = vmax.f32 %v953_v2, %v985_v11  ;;  %v1012_v24 = vmax.f32 %v948_v3, %v980_v12  ;;  %v3265_v2 = vadd.f32 %v3189_v19, %v916_v47 }
  0xb0   : > { %v1013_v26 = vmax.f32 %v949_v4, %v981_v14  ;;  %v1126_v3 = vmul.f32 1e+30, %v1094_v48  ;;  %v1072_v14 = vunpack.c.2.s8 %v3237_v33  ;;  %v1075_v48 = vunpack.c.3.s8 %v3251_v44 }
  0xb1   : > { %v3230_v30 = vsub.f32 %v1016_v22, %v1120_v49  ;;  %v3232_v31 = vsub.f32 %v1017_v23, %v1121_v50  ;;  %v3234_v32 = vsub.f32 %v1012_v24, %v1116_v55  ;;  %v1023_v55 = vmax.f32 %v3221_v21, %v991_v16 }
  0xb2   : > { %v881_v35 = vpop.permute.xlu1 %880  ;;  %v871_v36 = vpop.permute.xlu0 %870  ;;  %v3240_v37 = vsub.f32 %v1013_v26, %v1117_v56  ;;  %v1069_v56 = vunpack.c.0.s8 %v3251_v44  ;;  %v1000_v23 = vmul.f32 0.2, %v3262_v0  ;;  %v1001_v24 = vmul.f32 0.2, %v3265_v2 }
  0xb3   : > { %v954_v40 = vadd.f32 %v3187_v18, %v881_v35  ;;  %v955_v41 = vadd.f32 %v3189_v19, %v881_v35  ;;  %v950_v42 = vadd.f32 %v3187_v18, %v871_v36  ;;  %v951_v43 = vadd.f32 %v3189_v19, %v871_v36 }
  0xb4   : > { %v1202_v17 = vmax.f32 %v3230_v30, %v3232_v31  ;;  %v1196_v45 = vmax.f32 %v3234_v32, %v3240_v37  ;;  %v3294_v35 = vsub.f32 %v1022_v54, %v1126_v3  ;;  %v3299_v39 = vsub.f32 %v1023_v55, %v1127_v9 }
  0xb5   : > { %v986_v49 = vmul.f32 0.2, %v954_v40  ;;  %v987_v50 = vmul.f32 0.2, %v955_v41  ;;  %v982_v51 = vmul.f32 0.2, %v950_v42  ;;  %v1104_v16 = vcvt.s32.f32 %v1072_v14 }
  0xb6   : > { %v983_v53 = vmul.f32 0.2, %v951_v43  ;;  %1203 = vmax.xlane.f32.xlu1 %v1202_v17  ;;  %1197 = vmax.xlane.f32.xlu2 %v1196_v45  ;;  %v1100_v17 = vcvt.s32.f32 %v1068_v46  ;;  %v1101_v47 = vcvt.s32.f32 %v1069_v56  ;;  %v1033_v55 = vmax.f32 %v3265_v2, %v1001_v24 }
  0xb7   : > { %v1018_v59 = vmax.f32 %v954_v40, %v986_v49  ;;  %v1019_v60 = vmax.f32 %v955_v41, %v987_v50  ;;  %v1014_v63 = vmax.f32 %v950_v42, %v982_v51  ;;  %v1105_v40 = vcvt.s32.f32 %v1073_v15 }
  0xb8   : > { %v1015_v1 = vmax.f32 %v951_v43, %v983_v53  ;;  %v1032_v51 = vmax.f32 %v3262_v0, %v1000_v23  ;;  %v1133_v9 = vmul.f32 1e+30, %v1101_v47 }
  0xb9   : > { %v3268_v4 = vsub.f32 %v1018_v59, %v3204_v61  ;;  %v3271_v5 = vsub.f32 %v1019_v60, %v3206_v62  ;;  %v3273_v8 = vsub.f32 %v1014_v63, %v1118_v6  ;;  %v2996_v6 = vmov -1e+30  }
  0xba   : > { %v901_v10 = vpop.permute.xlu1 %900  ;;  %v896_v11 = vpop.permute.xlu0 %895  ;;  %v3276_v12 = vsub.f32 %v1015_v1, %v3213_v7  ;;  %430 = vst.msk [vmem:[#allocation2 + $0x10] sm:$0xff] %vm427_vm0, %v2996_v6  ;;  %v1137_v56 = vmul.f32 1e+30, %v1105_v40  ;;  %v1132_v59 = vmul.f32 1e+30, %v1100_v17  ;;  %v1211_v60 = vmax.f32 %v3294_v35, %v3299_v39 }
  0xbb   : > { %v962_v20 = vadd.f32 %v3187_v18, %v901_v10  ;;  %v963_v61 = vadd.f32 %v3189_v19, %v901_v10  ;;  %v960_v21 = vadd.f32 %v3187_v18, %v896_v11  ;;  %v961_v62 = vadd.f32 %v3189_v19, %v896_v11  ;;  %428 = vst.msk [vmem:[#allocation2] sm:$0xff] %vm427_vm0, %v2996_v6 }
  0xbc   : > { %v1205_v7 = vmax.f32 %v3268_v4, %v3271_v5  ;;  %v1199_v22 = vmax.f32 %v3273_v8, %v3276_v12  ;;  %429 = vst.msk [vmem:[#allocation2 + $0x8] sm:$0xff] %vm427_vm0, %v2996_v6  ;;  %v3343_v11 = vsub.f32 %v1033_v55, %v1137_v56 }
  0xbd   : > { %v994_v26 = vmul.f32 0.2, %v962_v20  ;;  %v995_v29 = vmul.f32 0.2, %v963_v61  ;;  %v992_v34 = vmul.f32 0.2, %v960_v21 }
  0xbe   : > { %v993_v36 = vmul.f32 0.2, %v961_v62  ;;  %1209 = vmax.xlane.f32.xlu1 %v1208_v13  ;;  %1206 = vmax.xlane.f32.xlu2 %v1205_v7  ;;  %431 = vst.msk [vmem:[#allocation2 + $0x18] sm:$0xff] %vm427_vm0, %v2996_v6  ;;  %v1074_v13 = vunpack.c.3.s8 %v3237_v33 }
  0xbf   : > { %v1026_v41 = vmax.f32 %v962_v20, %v994_v26  ;;  %v1027_v42 = vmax.f32 %v963_v61, %v995_v29  ;;  %v1024_v43 = vmax.f32 %v960_v21, %v992_v34  ;;  %1200 = vmax.xlane.f32.xlu0 %v1199_v22  ;;  %432 = vst.msk [vmem:[#allocation2 + $0x20] sm:$0xff] %vm427_vm0, %v2996_v6 }
  0xc0   : > { %v1025_v45 = vmax.f32 %v961_v62, %v993_v36  ;;  %433 = vst.msk [vmem:[#allocation2 + $0x28] sm:$0xff] %vm427_vm0, %v2996_v6  ;;  %v1106_v20 = vcvt.s32.f32 %v1074_v13  ;;  %v1107_v62 = vcvt.s32.f32 %v1075_v48 }
  0xc1   : > { %v3310_v49 = vsub.f32 %v1026_v41, %v3223_v25  ;;  %v3313_v50 = vsub.f32 %v1027_v42, %v3225_v27  ;;  %v3316_v46 = vsub.f32 %v1024_v43, %v3227_v28  ;;  %v1136_v25 = vmul.f32 1e+30, %v1104_v16  ;;  %434 = vst.msk [vmem:[#allocation2 + $0x30] sm:$0xff] %vm427_vm0, %v2996_v6  ;;  %v3375_v43 = vld [vmem:[#allocation2 + $0x10] sm:$0xff] }
  0xc2   : > { %v906_v52 = vpop.permute.xlu1 %905  ;;  %v921_v53 = vpop.permute.xlu0 %920  ;;  %v3322_v54 = vsub.f32 %v1025_v45, %v3242_v38  ;;  %435 = vst.msk [vmem:[#allocation2 + $0x38] sm:$0xff] %vm427_vm0, %v2996_v6  ;;  %v1138_v24 = vmul.f32 1e+30, %v1106_v20  ;;  %v1139_v36 = vmul.f32 1e+30, %v1107_v62  ;;  %v3377_v17 = vld [vmem:[#allocation2] sm:$0xff] }
  0xc3   : > { %v964_v27 = vadd.f32 %v3187_v18, %v906_v52  ;;  %v965_v28 = vadd.f32 %v3189_v19, %v906_v52  ;;  %v970_v38 = vadd.f32 %v3187_v18, %v921_v53  ;;  %v971_v63 = vadd.f32 %v3189_v19, %v921_v53  ;;  %436 = vst.msk [vmem:[#allocation2 + $0x40] sm:$0xff] %vm427_vm0, %v2996_v6 }
  0xc4   : > { %v1217_v0 = vmax.f32 %v3310_v49, %v3313_v50  ;;  %v1214_v1 = vmax.f32 %v3316_v46, %v3322_v54  ;;  %v3341_v10 = vsub.f32 %v1032_v51, %v1136_v25  ;;  %3859 = vst [vmem:[#allocation19_spill] sm:$0xff] %v3343_v11  ;;  %v3401_v25 = vld [vmem:[#allocation2 + $0x8] sm:$0xff] }
  0xc5   : > { %v996_v2 = vmul.f32 0.2, %v964_v27  ;;  %v997_v3 = vmul.f32 0.2, %v965_v28  ;;  %437 = vst.msk [vmem:[#allocation2 + $0x48] sm:$0xff] %vm427_vm0, %v2996_v6  ;;  %v3399_v55 = vld [vmem:[#allocation2 + $0x18] sm:$0xff] }
  0xc6   : > { %1218 = vmax.xlane.f32.xlu1 %v1217_v0  ;;  %1215 = vmax.xlane.f32.xlu2 %v1214_v1  ;;  %3858 = vst [vmem:[#allocation18_spill] sm:$0xff] %v3341_v10  ;;  %v1002_v61 = vmul.f32 0.2, %v970_v38  ;;  %v1003_v21 = vmul.f32 0.2, %v971_v63  ;;  %v1226_v23 = vmax.f32 %v3341_v10, %v3343_v11  ;;  %v3397_v53 = vld [vmem:[#allocation2 + $0x20] sm:$0xff] }
  0xc7   : > { %v1028_v14 = vmax.f32 %v964_v27, %v996_v2  ;;  %v1029_v15 = vmax.f32 %v965_v28, %v997_v3  ;;  %1212 = vmax.xlane.f32.xlu0 %v1211_v60  ;;  %438 = vst.msk [vmem:[#allocation2 + $0x50] sm:$0xff] %vm427_vm0, %v2996_v6  ;;  %v858_v28 = vld [vmem:[%s3163_s12 + $0x60] sm:$0xff]  ;;  %v2574_v10 = vld [vmem:[#allocation8 + $0x50] sm:$0xff] }
  0xc8   : > { %439 = vst.msk [vmem:[#allocation2 + $0x58] sm:$0xff] %vm427_vm0, %v2996_v6  ;;  %v1034_v26 = vmax.f32 %v970_v38, %v1002_v61  ;;  %v1035_v29 = vmax.f32 %v971_v63, %v1003_v21  ;;  %v859_v61 = vld [vmem:[%s3163_s12 + $0x68] sm:$0xff] }
  0xc9   : > { %v3351_v7 = vsub.f32 %v1028_v14, %v1132_v59  ;;  %v3353_v22 = vsub.f32 %v1029_v15, %v1133_v9  ;;  %440 = vst.msk [vmem:[#allocation2 + $0x60] sm:$0xff] %vm427_vm0, %v2996_v6  ;;  %v3427_v3 = vld [vmem:[#allocation2 + $0x38] sm:$0xff]  ;;  %v3429_v9 = vld [vmem:[#allocation2 + $0x30] sm:$0xff]  ;;  %v3431_v14 = vld [vmem:[#allocation2 + $0x28] sm:$0xff] }
  0xca   : > { %441 = vst.msk [vmem:[#allocation2 + $0x68] sm:$0xff] %vm427_vm0, %v2996_v6  ;;  %v3367_v16 = vsub.f32 %v1034_v26, %v1138_v24  ;;  %v3369_v40 = vsub.f32 %v1035_v29, %v1139_v36  ;;  %v3373_v42 = vpop.permute.xlu1 %910  ;;  %v3456_v36 = vld [vmem:[#allocation2 + $0x40] sm:$0xff] }
  0xcb   : > { %3860 = vst [vmem:[#allocation20_spill] sm:$0xff] %v3351_v7  ;;  %v1220_v34 = vmax.f32 %v3351_v7, %v3353_v22 }
  0xcc   : > { %3861 = vst [vmem:[#allocation21_spill] sm:$0xff] %v3353_v22  ;;  %v1229_v41 = vmax.f32 %v3367_v16, %v3369_v40 }
  0xcd   : > { %442 = vst.msk [vmem:[#allocation2 + $0x70] sm:$0xff] %vm427_vm0, %v2996_v6 }
  0xce   : > { %443 = vst.msk [vmem:[#allocation2 + $0x78] sm:$0xff] %vm427_vm0, %v2996_v6  ;;  %1221 = vmax.xlane.f32.xlu1 %v1220_v34  ;;  %1227 = vmax.xlane.f32.xlu2 %v1226_v23  ;;  %v3379_v6 = vpop.permute.xlu0 %940 }
  0xcf   : > { %3862 = vst [vmem:[#allocation22_spill] sm:$0xff] %v3367_v16  ;;  %v2566_v16 = vld [vmem:[#allocation8 + $0x10] sm:$0xff] }
  0xd0   : > { %3863 = vst [vmem:[#allocation23_spill] sm:$0xff] %v3369_v40 }
  0xd1   : > { %3864 = vst [vmem:[#allocation24_spill] sm:$0xff] %v3456_v36 }
  0xd6   : > { %1230 = vmax.xlane.f32.xlu1 %v1229_v41  ;;  %v3458_v41 = vld [vmem:[#allocation2 + $0x50] sm:$0xff] }
  0xd7   : > { %3865 = vst [vmem:[#allocation25_spill] sm:$0xff] %v3458_v41 }
 0x129   : > { %v1204_v45 = vpop.xlane.xlu1 %1203  ;;  %v1198_v47 = vpop.xlane.xlu2 %1197 }
 0x12a   : > { %v3382_v13 = vmax.f32 %v3375_v43, %v1204_v45  ;;  %v3385_v48 = vmax.f32 %v3377_v17, %v1198_v47  ;;  %v860_v47 = vld [vmem:[%s3163_s12 + $0x70] sm:$0xff] }
 0x12c   : > { %1921 = vst.msk [vmem:[#allocation2 + $0x10] sm:$0xff] %vm427_vm0, %v3382_v13  ;;  %1320 = vperm.xlu0 %2673, %v3382_v13   ;;  %1310 = vperm.xlu2 %2675, %v3385_v48  }
 0x12d   : > { %1919 = vst.msk [vmem:[#allocation2] sm:$0xff] %vm427_vm0, %v3385_v48 }
 0x131   : > { %v1210_v56 = vpop.xlane.xlu1 %1209  ;;  %v1207_v27 = vpop.xlane.xlu2 %1206 }
 0x132   : > { %v3405_v59 = vmax.f32 %v3397_v53, %v1210_v56  ;;  %v3408_v60 = vmax.f32 %v3399_v55, %v1207_v27  ;;  %v1201_v38 = vpop.xlane.xlu0 %1200 }
 0x133   : > { %v3411_v63 = vmax.f32 %v3401_v25, %v1201_v38 }
 0x134   : > { %1923 = vst.msk [vmem:[#allocation2 + $0x20] sm:$0xff] %vm427_vm0, %v3405_v59  ;;  %1325 = vperm.xlu0 %2673, %v3408_v60   ;;  %925 = vperm.xlu2 %2675, %v858_v28  }
 0x135   : > { %1922 = vst.msk [vmem:[#allocation2 + $0x18] sm:$0xff] %vm427_vm0, %v3408_v60  ;;  %1315 = vperm.xlu1 %2674, %v3411_v63  }
 0x136   : > { %1920 = vst.msk [vmem:[#allocation2 + $0x8] sm:$0xff] %vm427_vm0, %v3411_v63 }
 0x139   : > { %v1219_v15 = vpop.xlane.xlu1 %1218  ;;  %v1216_v20 = vpop.xlane.xlu2 %1215 }
 0x13a   : > { %v3435_v21 = vmax.f32 %v3427_v3, %v1219_v15  ;;  %v3438_v62 = vmax.f32 %v3429_v9, %v1216_v20  ;;  %v1213_v23 = vpop.xlane.xlu0 %1212  ;;  %v3473_v15 = vld [vmem:[#allocation2 + $0x58] sm:$0xff] }
 0x13b   : > { %v3441_v24 = vmax.f32 %v3431_v14, %v1213_v23  ;;  %3867 = vst [vmem:[#allocation27_spill] sm:$0xff] %v3473_v15  ;;  %v966_v23 = vadd.f32 %v3187_v18, %v3373_v42 }
 0x13c   : > { %1926 = vst.msk [vmem:[#allocation2 + $0x38] sm:$0xff] %vm427_vm0, %v3435_v21  ;;  %930 = vperm.xlu2 %2675, %v859_v61  }
 0x13d   : > { %1925 = vst.msk [vmem:[#allocation2 + $0x30] sm:$0xff] %vm427_vm0, %v3438_v62  ;;  %1330 = vperm.xlu1 %2674, %v3405_v59   ;;  %v998_v38 = vmul.f32 0.2, %v966_v23 }
 0x13e   : > { %1924 = vst.msk [vmem:[#allocation2 + $0x28] sm:$0xff] %vm427_vm0, %v3441_v24 }
 0x13f   : > { %v1030_v0 = vmax.f32 %v966_v23, %v998_v38  ;;  %v3499_v38 = vld [vmem:[%s3148_s20 + $0x30] sm:$0xff]  ;;  %v1051_v23 = vld [vmem:[%s3148_s20 + $0x38] sm:$0xff]  ;;  %s2159_s20 = sshll.u32 %s3717_s19, 4  ;;  %s2160_s20 = int_to_ptr.vmem [resolvable:$true] %s2159_s20 }
 0x140   : > { %v1079_v40 = vunpack.c.1.s8 %v1051_v23 }
 0x141   : > { %v1222_v45 = vpop.xlane.xlu1 %1221  ;;  %v1228_v56 = vpop.xlane.xlu2 %1227 }
 0x142   : > { %v3462_v27 = vmax.f32 %v3456_v36, %v1222_v45  ;;  %v3465_v28 = vmax.f32 %v3458_v41, %v1228_v56  ;;  %v967_v45 = vadd.f32 %v3189_v19, %v3373_v42  ;;  %v1071_v56 = vunpack.c.1.s8 %v3251_v44  ;;  %v2579_v44 = vld [vmem:[#allocation8 + $0x78] sm:$0xff] }
 0x143   : > { %1837 = vmatpush.bf16.msra.mxu3 %v2579_v44  ;;  %v2567_v44 = vld [vmem:[#allocation8 + $0x18] sm:$0xff] }
 0x144   : > { %3866 = vst [vmem:[#allocation26_spill] sm:$0xff] %v3462_v27  ;;  %935 = vperm.xlu2 %2675, %v860_v47   ;;  %v1070_v47 = vunpack.c.1.s8 %v3237_v33  ;;  %v999_v26 = vmul.f32 0.2, %v967_v45  ;;  %v2571_v33 = vld [vmem:[#allocation8 + $0x38] sm:$0xff] }
 0x145   : > { %1927 = vst.msk [vmem:[#allocation2 + $0x40] sm:$0xff] %vm427_vm0, %v3462_v27  ;;  %1788 = vmatpush.bf16.msra.mxu2 %v2571_v33 }
 0x146   : > { %1929 = vst.msk [vmem:[#allocation2 + $0x50] sm:$0xff] %vm427_vm0, %v3465_v28  ;;  %v1102_v34 = vcvt.s32.f32 %v1070_v47  ;;  %v1031_v1 = vmax.f32 %v967_v45, %v999_v26  ;;  %v2570_v26 = vld [vmem:[#allocation8 + $0x30] sm:$0xff]  ;;  %v1076_v45 = vunpack.c.0.s8 %v3499_v38  ;;  %v1077_v47 = vunpack.c.0.s8 %v1051_v23 }
 0x148   : > { %v1134_v51 = vmul.f32 1e+30, %v1102_v34  ;;  %v2578_v34 = vld [vmem:[#allocation8 + $0x70] sm:$0xff] }
 0x149   : > { %v1231_v20 = vpop.xlane.xlu1 %1230  ;;  %1789 = vmatpush.bf16.msra.mxu2 %v2570_v26  ;;  %1838 = vmatpush.bf16.msra.mxu3 %v2578_v34  ;;  %v2575_v26 = vld [vmem:[#allocation8 + $0x58] sm:$0xff] }
 0x14a   : > { %v3476_v61 = vmax.f32 %v3473_v15, %v1231_v20  ;;  %v1103_v20 = vcvt.s32.f32 %v1071_v56  ;;  %v3487_v29 = vsub.f32 %v1030_v0, %v1134_v51  ;;  %v2569_v51 = vld [vmem:[#allocation8 + $0x28] sm:$0xff]  ;;  %v2568_v0 = vld [vmem:[#allocation8 + $0x20] sm:$0xff]  ;;  %v1108_v56 = vcvt.s32.f32 %v1076_v45 }
 0x14b   : > { %v1078_v15 = vunpack.c.1.s8 %v3499_v38 }
 0x14c   : > { %1930 = vst.msk [vmem:[#allocation2 + $0x58] sm:$0xff] %vm427_vm0, %v3476_v61  ;;  %1335 = vperm.xlu2 %2675, %v3441_v24   ;;  %v1135_v52 = vmul.f32 1e+30, %v1103_v20  ;;  %v1109_v20 = vcvt.s32.f32 %v1077_v47 }
 0x14d   : > { %3868 = vst [vmem:[#allocation28_spill] sm:$0xff] %v3487_v29  ;;  %1790 = vmatpush.bf16.msra.mxu2 %v2569_v51  ;;  %v1110_v41 = vcvt.s32.f32 %v1078_v15  ;;  %v1080_v15 = vunpack.c.2.s8 %v3499_v38 }
 0x14e   : > { %v3489_v42 = vsub.f32 %v1031_v1, %v1135_v52  ;;  %v2577_v52 = vld [vmem:[#allocation8 + $0x68] sm:$0xff]  ;;  %v2576_v1 = vld [vmem:[#allocation8 + $0x60] sm:$0xff]  ;;  %v1141_v11 = vmul.f32 1e+30, %v1109_v20 }
 0x14f   : > { %1839 = vmatpush.bf16.msra.mxu3 %v2577_v52  ;;  %v1140_v52 = vmul.f32 1e+30, %v1108_v56  ;;  %v1111_v56 = vcvt.s32.f32 %v1079_v40  ;;  %v1081_v40 = vunpack.c.2.s8 %v1051_v23 }
 0x150   : > { %3869 = vst [vmem:[#allocation29_spill] sm:$0xff] %v3489_v42  ;;  %v1223_v2 = vmax.f32 %v3487_v29, %v3489_v42  ;;  %v2565_v42 = vld [vmem:[#allocation8 + $0x8] sm:$0xff] }
 0x151   : > { %1791 = vmatpush.bf16.msra.mxu2 %v2568_v0 }
 0x153   : > { %1840 = vmatpush.bf16.msra.mxu3 %v2576_v1 }
 0x155   : > { %1792 = vmatpush.bf16.msra.mxu2 %v2567_v44  ;;  %v2573_v44 = vld [vmem:[#allocation8 + $0x48] sm:$0xff] }
 0x157   : > { %1841 = vmatpush.bf16.msra.mxu3 %v2575_v26 }
 0x159   : > { %1793 = vmatpush.bf16.msra.mxu2 %v2566_v16 }
 0x15b   : > { %1842 = vmatpush.bf16.msra.mxu3 %v2574_v10 }
 0x15d   : > { %1794 = vmatpush.bf16.msra.mxu2 %v2565_v42  ;;  %v1112_v42 = vcvt.s32.f32 %v1080_v15 }
 0x15e   : > { %1224 = vmax.xlane.f32.xlu0 %v1223_v2 }
 0x15f   : > { %1843 = vmatpush.bf16.msra.mxu3 %v2573_v44 }
 0x172   : > { %1340 = vperm.xlu0 %2673, %v3438_v62  }
 0x17a   : > { %1345 = vperm.xlu0 %2673, %v3435_v21  }
 0x182   : > { %1350 = vperm.xlu0 %2673, %v3462_v27  }
 0x186   : > { %v3496_v2 = vpop.permute.xlu2 %1310 }
 0x18e   : > { %v926_v33 = vpop.permute.xlu2 %925 }
 0x18f   : > { %v972_v34 = vadd.f32 %v3187_v18, %v926_v33  ;;  %v973_v51 = vadd.f32 %v3189_v19, %v926_v33 }
 0x191   : > { %v1004_v0 = vmul.f32 0.2, %v972_v34  ;;  %v1005_v1 = vmul.f32 0.2, %v973_v51 }
 0x193   : > { %v1036_v45 = vmax.f32 %v972_v34, %v1004_v0  ;;  %v1037_v47 = vmax.f32 %v973_v51, %v1005_v1  ;;  %v1142_v34 = vmul.f32 1e+30, %v1110_v41  ;;  %v978_v51 = vadd.f32 %v3187_v18, %v3379_v6  ;;  %v2572_v41 = vld [vmem:[#allocation8 + $0x40] sm:$0xff] }
 0x194   : > { %v1082_v0 = vunpack.c.3.s8 %v3499_v38  ;;  %v1083_v1 = vunpack.c.3.s8 %v1051_v23  ;;  %1844 = vmatpush.bf16.msra.mxu3 %v2572_v41 }
 0x195   : > { %v3506_v27 = vsub.f32 %v1036_v45, %v1140_v52  ;;  %v3508_v36 = vsub.f32 %v1037_v47, %v1141_v11  ;;  %v1143_v11 = vmul.f32 1e+30, %v1111_v56  ;;  %v979_v52 = vadd.f32 %v3189_v19, %v3379_v6  ;;  %v2564_v45 = vld [vmem:[#allocation8] sm:$0xff] }
 0x196   : > { %v931_v33 = vpop.permute.xlu2 %930  ;;  %1795 = vmatpush.bf16.msra.mxu2 %v2564_v45  ;;  %v1113_v56 = vcvt.s32.f32 %v1081_v40  ;;  %v1114_v7 = vcvt.s32.f32 %v1082_v0  ;;  %v1115_v6 = vcvt.s32.f32 %v1083_v1 }
 0x197   : > { %3870 = vst [vmem:[#allocation30_spill] sm:$0xff] %v3506_v27  ;;  %v974_v26 = vadd.f32 %v3187_v18, %v931_v33  ;;  %v975_v20 = vadd.f32 %v3189_v19, %v931_v33  ;;  %v1232_v29 = vmax.f32 %v3506_v27, %v3508_v36  ;;  %v1011_v27 = vmul.f32 0.2, %v979_v52 }
 0x198   : > { %3871 = vst [vmem:[#allocation31_spill] sm:$0xff] %v3508_v36  ;;  %v1010_v36 = vmul.f32 0.2, %v978_v51  ;;  %v1146_v40 = vmul.f32 1e+30, %v1114_v7 }
 0x199   : > { %v1006_v10 = vmul.f32 0.2, %v974_v26  ;;  %v1007_v16 = vmul.f32 0.2, %v975_v20  ;;  %1233 = vmax.xlane.f32.xlu2 %v1232_v29  ;;  %v1147_v45 = vmul.f32 1e+30, %v1115_v6 }
 0x19b   : > { %v1038_v47 = vmax.f32 %v974_v26, %v1006_v10  ;;  %v1039_v33 = vmax.f32 %v975_v20, %v1007_v16  ;;  %v1144_v20 = vmul.f32 1e+30, %v1112_v42  ;;  %v1042_v16 = vmax.f32 %v978_v51, %v1010_v36 }
 0x19c   : > { %v1389_v36 = vsub.f32 %v3240_v37, %v3496_v2 }
 0x19d   : > { %v3520_v44 = vsub.f32 %v1038_v47, %v1142_v34  ;;  %v3522_v29 = vsub.f32 %v1039_v33, %v1143_v11  ;;  %v1145_v34 = vmul.f32 1e+30, %v1113_v56  ;;  %v1043_v11 = vmax.f32 %v979_v52, %v1011_v27 }
 0x19e   : > { %v936_v22 = vpop.permute.xlu2 %935  ;;  %v1321_v0 = vpop.permute.xlu0 %1320  ;;  %v1388_v33 = vsub.f32 %v3234_v32, %v3496_v2 }
 0x19f   : > { %v976_v38 = vadd.f32 %v3187_v18, %v936_v22  ;;  %v977_v23 = vadd.f32 %v3189_v19, %v936_v22  ;;  %v1235_v26 = vmax.f32 %v3520_v44, %v3522_v29  ;;  %v3532_v19 = vsub.f32 %v1042_v16, %v1146_v40 }
 0x1a0   : > { %v3534_v22 = vsub.f32 %v1043_v11, %v1147_v45  ;;  %v1393_v16 = vsub.f32 %v3232_v31, %v1321_v0  ;;  %v3872_v11 = vsub.f32 %v3401_v25, %v3411_v63  ;;  %v3873_v31 = vsub.f32 %v3429_v9, %v3438_v62 }
 0x1a1   : > { %v1008_v15 = vmul.f32 0.2, %v976_v38  ;;  %v1009_v10 = vmul.f32 0.2, %v977_v23  ;;  %1236 = vmax.xlane.f32.xlu1 %v1235_v26 }
 0x1a2   : > { %v1241_v6 = vmax.f32 %v3532_v19, %v3534_v22  ;;  %v1278_v40 = vmul.f32 1.442695, %v3872_v11 }
 0x1a3   : > { %v1040_v41 = vmax.f32 %v976_v38, %v1008_v15  ;;  %v1041_v47 = vmax.f32 %v977_v23, %v1009_v10 }
 0x1a5   : > { %v3528_v1 = vsub.f32 %v1040_v41, %v1144_v20  ;;  %v3530_v18 = vsub.f32 %v1041_v47, %v1145_v34  ;;  %v1392_v34 = vsub.f32 %v3230_v30, %v1321_v0  ;;  %v1288_v0 = vmul.f32 1.442695, %v3873_v31 }
 0x1a6   : > { %v1326_v26 = vpop.permute.xlu0 %1325 }
 0x1a7   : > { %v1316_v42 = vpop.permute.xlu1 %1315  ;;  %v1238_v51 = vmax.f32 %v3528_v1, %v3530_v18  ;;  %v1395_v15 = vsub.f32 %v3271_v5, %v1326_v26 }
 0x1a8   : > { %v1390_v7 = vsub.f32 %v3273_v8, %v1316_v42  ;;  %v1391_v27 = vsub.f32 %v3276_v12, %v1316_v42  ;;  %v1394_v8 = vsub.f32 %v3268_v4, %v1326_v26 }
 0x1a9   : > { %1239 = vmax.xlane.f32.xlu1 %v1238_v51  ;;  %v1423_v41 = vpack.c.bf16 %v1395_v15, %v1393_v16 }
 0x1aa   : > { %v1420_v52 = vpack.c.bf16 %v1390_v7, %v1388_v33  ;;  %v1421_v56 = vpack.c.bf16 %v1391_v27, %v1389_v36  ;;  %v1422_v45 = vpack.c.bf16 %v1394_v8, %v1392_v34 }
 0x1ab   : > { %v1441_v5 = vunpack.c.l.bf16 %v1423_v41  ;;  %v1443_v7 = vunpack.c.h.bf16 %v1423_v41 }
 0x1ac   : > { %v1436_v38 = vunpack.c.l.bf16 %v1420_v52  ;;  %v1437_v23 = vunpack.c.l.bf16 %v1421_v56  ;;  %1242 = vmax.xlane.f32.xlu0 %v1241_v6  ;;  %v1438_v32 = vunpack.c.h.bf16 %v1420_v52  ;;  %v1439_v20 = vunpack.c.h.bf16 %v1421_v56 }
 0x1ad   : > { %v1440_v4 = vunpack.c.l.bf16 %v1422_v45  ;;  %v1442_v36 = vunpack.c.h.bf16 %v1422_v45  ;;  %v1478_v51 = vmul.f32 1.442695, %v1441_v5 }
 0x1ae   : > { %v1468_v37 = vmul.f32 1.442695, %v1436_v38  ;;  %v1470_v2 = vmul.f32 1.442695, %v1437_v23  ;;  %v1472_v12 = vmul.f32 1.442695, %v1438_v32  ;;  %v1336_v23 = vpop.permute.xlu2 %1335 }
 0x1af   : > { %v1474_v10 = vmul.f32 1.442695, %v1439_v20  ;;  %v1476_v25 = vmul.f32 1.442695, %v1440_v4  ;;  %v1331_v52 = vpop.permute.xlu1 %1330  ;;  %v1480_v6 = vmul.f32 1.442695, %v1442_v36  ;;  %v1398_v62 = vsub.f32 %v3294_v35, %v1336_v23 }
 0x1b0   : > { %2679 = vpow2.f32 %v1468_v37  ;;  %v1482_v38 = vmul.f32 1.442695, %v1443_v7  ;;  %v1396_v32 = vsub.f32 %v3200_v57, %v1331_v52  ;;  %v1397_v9 = vsub.f32 %v3202_v58, %v1331_v52 }
 0x1b1   : > { %2681 = vpow2.f32 %v1470_v2  ;;  %v1399_v26 = vsub.f32 %v3299_v39, %v1336_v23  ;;  %v1189_v39 = vld [vmem:[#allocation2 + $0x48] sm:$0xff] }
 0x1b2   : > { %2683 = vpow2.f32 %v1472_v12  ;;  %v1424_v20 = vpack.c.bf16 %v1398_v62, %v1396_v32 }
 0x1b3   : > { %2685 = vpow2.f32 %v1474_v10  ;;  %v1425_v2 = vpack.c.bf16 %v1399_v26, %v1397_v9 }
 0x1b4   : > { %2687 = vpow2.f32 %v1278_v40  ;;  %v1444_v10 = vunpack.c.l.bf16 %v1424_v20  ;;  %v1446_v16 = vunpack.c.h.bf16 %v1424_v20 }
 0x1b5   : > { %2689 = vpow2.f32 %v1288_v0  ;;  %v1445_v34 = vunpack.c.l.bf16 %v1425_v2  ;;  %v1447_v58 = vunpack.c.h.bf16 %v1425_v2 }
 0x1b6   : > { %v2680_v47 = vpop.eup %2679  ;;  %2691 = vpow2.f32 %v1476_v25  ;;  %v1484_v40 = vmul.f32 1.442695, %v1444_v10  ;;  %v1488_v41 = vmul.f32 1.442695, %v1446_v16  ;;  %v2563_v10 = vld [vmem:[#allocation5 + $0x78] sm:$0xff] }
 0x1b7   : > { %v2682_v33 = vpop.eup %2681  ;;  %2693 = vpow2.f32 %v1478_v51  ;;  %v1486_v45 = vmul.f32 1.442695, %v1445_v34  ;;  %765 = vmatpush.bf16.msra.mxu1 %v2563_v10 }
 0x1b8   : > { %v2684_v42 = vpop.eup %2683  ;;  %2695 = vpow2.f32 %v1480_v6 }
 0x1b9   : > { %v2686_v30 = vpop.eup %2685  ;;  %v1532_v27 = vpack.c.bf16 %v2684_v42, %v2680_v47  ;;  %2697 = vpow2.f32 %v1482_v38  ;;  %v1490_v47 = vmul.f32 1.442695, %v1447_v58 }
 0x1ba   : > { %v1533_v63 = vpack.c.bf16 %v2686_v30, %v2682_v33  ;;  %v2688_v56 = vpop.eup %2687  ;;  %2699 = vpow2.f32 %v1484_v40  ;;  %v2552_v40 = vld [vmem:[#allocation5 + $0x20] sm:$0xff] }
 0x1bb   : > { %1796 = vmatmul.bf16.vlgmr.msra.gmra.mxu2 %v1532_v27  ;;  %v2690_v37 = vpop.eup %2689  ;;  %2701 = vpow2.f32 %v1486_v45 }
 0x1bc   : > { %1845 = vmatmul.bf16.vlgmr.msra.gmra.mxu3 %v1533_v63  ;;  %v2692_v8 = vpop.eup %2691  ;;  %2703 = vpow2.f32 %v1488_v41  ;;  %v2551_v41 = vld [vmem:[#allocation5 + $0x18] sm:$0xff] }
 0x1bd   : > { %v2694_v12 = vpop.eup %2693  ;;  %2705 = vpow2.f32 %v1490_v47  ;;  %v2550_v47 = vld [vmem:[#allocation5 + $0x10] sm:$0xff] }
 0x1be   : > { %v2696_v15 = vpop.eup %2695 }
 0x1bf   : > { %v2698_v57 = vpop.eup %2697  ;;  %v1534_v11 = vpack.c.bf16 %v2696_v15, %v2692_v8  ;;  %v2555_v15 = vld [vmem:[#allocation5 + $0x38] sm:$0xff] }
 0x1c0   : > { %1571 = vperm.xlu0 %2673, %v2688_v56   ;;  %v1535_v35 = vpack.c.bf16 %v2698_v57, %v2694_v12  ;;  %v2700_v36 = vpop.eup %2699  ;;  %716 = vmatpush.bf16.msra.mxu0 %v2555_v15  ;;  %v2561_v57 = vld [vmem:[#allocation5 + $0x68] sm:$0xff]  ;;  %v3875_v15 = vsub.f32 %v3375_v43, %v3382_v13  ;;  %v3877_v13 = vsub.f32 %v3397_v53, %v3405_v59  ;;  %v3881_v59 = vld [vmem:[#allocation21_spill] sm:$0xff] }
 0x1c1   : > { %v2702_v30 = vpop.eup %2701 }
 0x1c2   : > { %1360 = vperm.xlu1 %2674, %v3465_v28   ;;  %v2704_v31 = vpop.eup %2703  ;;  %v1280_v10 = vmul.f32 1.442695, %v3875_v15 }
 0x1c3   : > { %v2706_v0 = vpop.eup %2705  ;;  %v1536_v7 = vpack.c.bf16 %v2704_v31, %v2700_v36  ;;  %v2548_v31 = vld [vmem:[#allocation5] sm:$0xff] }
 0x1c4   : > { %v1537_v27 = vpack.c.bf16 %v2706_v0, %v2702_v30  ;;  %v2556_v0 = vld [vmem:[#allocation5 + $0x40] sm:$0xff] }
 0x1c8   : > { %1596 = vperm.xlu0 %2673, %v2690_v37  }
 0x1cb   : > { %1801 = vmatmul.bf16.gmra.mxu2 %v1534_v11 }
 0x1cc   : > { %1850 = vmatmul.bf16.gmra.mxu3 %v1535_v35  ;;  %v2560_v35 = vld [vmem:[#allocation5 + $0x60] sm:$0xff] }
 0x1d1   : > { %v1225_v4 = vpop.xlane.xlu0 %1224 }
 0x1d2   : > { %v1253_v33 = vmax.f32 %v1189_v39, %v1225_v4  ;;  %v2558_v4 = vld [vmem:[#allocation5 + $0x50] sm:$0xff] }
 0x1d4   : > { %v1269_v5 = vsub.f32 %v1189_v39, %v1253_v33  ;;  %1928 = vst.msk [vmem:[#allocation2 + $0x48] sm:$0xff] %vm427_vm0, %v1253_v33  ;;  %1355 = vperm.xlu2 %2675, %v1253_v33   ;;  %v2559_v39 = vld [vmem:[#allocation5 + $0x58] sm:$0xff]  ;;  %v1192_v33 = vld [vmem:[#allocation2 + $0x60] sm:$0xff] }
 0x1d6   : > { %v1294_v42 = vmul.f32 1.442695, %v1269_v5  ;;  %v2549_v5 = vld [vmem:[#allocation5 + $0x8] sm:$0xff] }
 0x1d8   : > { %2707 = vpow2.f32 %v1294_v42  ;;  %v2557_v42 = vld [vmem:[#allocation5 + $0x48] sm:$0xff] }
 0x1db   : > { %1806 = vmatmul.bf16.gmra.mxu2 %v1536_v7  ;;  %v2334_v7 = vld [vmem:[%s3572_s17] sm:$0xf] }
 0x1dc   : > { %1365 = vperm.xlu2 %2675, %v3476_v61   ;;  %1855 = vmatmul.bf16.gmra.mxu3 %v1537_v27  ;;  %v2533_v27 = vld [vmem:[%s3572_s17 + $0x4] sm:$0xf0] }
 0x1de   : > { %v2708_v25 = vpop.eup %2707 }
 0x1df   : > { %1611 = vperm.xlu0 %2673, %v2708_v25   ;;  %v2532_v25 = vld [vmem:[%s3572_s17 + $0x4] sm:$0xf] }
 0x1e4   : > { %v1341_v63 = vpop.permute.xlu0 %1340 }
 0x1e5   : > { %v1400_v52 = vsub.f32 %v3316_v46, %v1341_v63  ;;  %v1401_v56 = vsub.f32 %v3322_v54, %v1341_v63  ;;  %v2554_v46 = vld [vmem:[#allocation5 + $0x30] sm:$0xff]  ;;  %v2553_v54 = vld [vmem:[#allocation5 + $0x28] sm:$0xff] }
 0x1e6   : > { %717 = vmatpush.bf16.msra.mxu0 %v2554_v46  ;;  %v2336_v63 = vld [vmem:[%s3572_s17 + $0x8] sm:$0xf0] }
 0x1ea   : > { %718 = vmatpush.bf16.msra.mxu0 %v2553_v54 }
 0x1ec   : > { %v1346_v51 = vpop.permute.xlu0 %1345 }
 0x1ed   : > { %v1402_v6 = vsub.f32 %v3310_v49, %v1346_v51  ;;  %v1403_v38 = vsub.f32 %v3313_v50, %v1346_v51  ;;  %v2562_v49 = vld [vmem:[#allocation5 + $0x70] sm:$0xff] }
 0x1ee   : > { %766 = vmatpush.bf16.msra.mxu1 %v2562_v49  ;;  %719 = vmatpush.bf16.msra.mxu0 %v2552_v40 }
 0x1ef   : > { %v1426_v23 = vpack.c.bf16 %v1402_v6, %v1400_v52  ;;  %v1427_v32 = vpack.c.bf16 %v1403_v38, %v1401_v56  ;;  %v2335_v56 = vor.u32 %v2533_v27, %v2334_v7  ;;  %v2339_v6 = vor.u32 %v2532_v25, %v2336_v63  ;;  %v3579_v38 = vld [vmem:[#allocation2 + $0x68] sm:$0xff] }
 0x1f1   : > { %v1448_v9 = vunpack.c.l.bf16 %v1426_v23  ;;  %v1449_v62 = vunpack.c.l.bf16 %v1427_v32  ;;  %v1450_v26 = vunpack.c.h.bf16 %v1426_v23  ;;  %v1451_v20 = vunpack.c.h.bf16 %v1427_v32 }
 0x1f2   : > { %767 = vmatpush.bf16.msra.mxu1 %v2561_v57  ;;  %720 = vmatpush.bf16.msra.mxu0 %v2551_v41  ;;  %v1284_v57 = vmul.f32 1.442695, %v3877_v13 }
 0x1f3   : > { %v1492_v37 = vmul.f32 1.442695, %v1448_v9  ;;  %v1494_v2 = vmul.f32 1.442695, %v1449_v62  ;;  %v1496_v8 = vmul.f32 1.442695, %v1450_v26 }
 0x1f4   : > { %v1498_v12 = vmul.f32 1.442695, %v1451_v20  ;;  %v1351_v9 = vpop.permute.xlu0 %1350  ;;  %v3587_v26 = vld [vmem:[#allocation2 + $0x70] sm:$0xff]  ;;  %v3874_v20 = vsub.f32 %v3377_v17, %v3385_v48  ;;  %v3876_v48 = vsub.f32 %v3399_v55, %v3408_v60  ;;  %v3879_v55 = vsub.f32 %v3427_v3, %v3435_v21 }
 0x1f5   : > { %2709 = vpow2.f32 %v1492_v37  ;;  %v1405_v41 = vsub.f32 %v3881_v59, %v1351_v9 }
 0x1f6   : > { %2711 = vpow2.f32 %v1494_v2  ;;  %768 = vmatpush.bf16.msra.mxu1 %v2560_v35  ;;  %721 = vmatpush.bf16.msra.mxu0 %v2550_v47  ;;  %v1276_v37 = vmul.f32 1.442695, %v3874_v20  ;;  %v1282_v54 = vmul.f32 1.442695, %v3876_v48  ;;  %v1290_v60 = vmul.f32 1.442695, %v3879_v55 }
 0x1f7   : > { %2713 = vpow2.f32 %v1496_v8  ;;  %v1195_v8 = vld [vmem:[#allocation2 + $0x78] sm:$0xff]  ;;  %v3888_v20 = vld [vmem:[#allocation18_spill] sm:$0xff] }
 0x1f8   : > { %2715 = vpow2.f32 %v1498_v12 }
 0x1fa   : > { %769 = vmatpush.bf16.msra.mxu1 %v2559_v39  ;;  %722 = vmatpush.bf16.msra.mxu0 %v2549_v5  ;;  %v3882_v39 = vld [vmem:[#allocation28_spill] sm:$0xff] }
 0x1fb   : > { %v2710_v50 = vpop.eup %2709 }
 0x1fc   : > { %v2712_v34 = vpop.eup %2711 }
 0x1fd   : > { %v2714_v16 = vpop.eup %2713 }
 0x1fe   : > { %v2716_v58 = vpop.eup %2715  ;;  %v1538_v11 = vpack.c.bf16 %v2714_v16, %v2710_v50  ;;  %770 = vmatpush.bf16.msra.mxu1 %v2558_v4  ;;  %723 = vmatpush.bf16.msra.mxu0 %v2548_v31  ;;  %v3883_v4 = vld [vmem:[#allocation29_spill] sm:$0xff] }
 0x1ff   : > { %v1539_v45 = vpack.c.bf16 %v2716_v58, %v2712_v34  ;;  %v3878_v58 = vsub.f32 %v3431_v14, %v3441_v24 }
 0x200   : > { %1811 = vmatmul.bf16.gmra.mxu2 %v1538_v11 }
 0x201   : > { %1860 = vmatmul.bf16.gmra.mxu3 %v1539_v45  ;;  %724 = vmatmul.bf16.vlgmr.msra.gmra.mxu0 %v2335_v56  ;;  %v1286_v11 = vmul.f32 1.442695, %v3878_v58  ;;  %v3880_v45 = vld [vmem:[#allocation20_spill] sm:$0xff]  ;;  %v2997_v58 = vmov 127  }
 0x202   : > { %771 = vmatpush.bf16.msra.mxu1 %v2557_v42  ;;  %v1404_v53 = vsub.f32 %v3880_v45, %v1351_v9  ;;  %v3884_v42 = vld [vmem:[#allocation24_spill] sm:$0xff] }
 0x206   : > { %772 = vmatpush.bf16.msra.mxu1 %v2556_v0 }
 0x209   : > { %773 = vmatmul.bf16.vlgmr.msra.gmra.mxu1 %v2339_v6 }
 0x20c   : > { %v1234_v36 = vpop.xlane.xlu2 %1233 }
 0x20d   : > { %v1256_v30 = vmax.f32 %v1192_v33, %v1234_v36  ;;  %v3885_v36 = vld [vmem:[#allocation26_spill] sm:$0xff] }
 0x20e   : > { %v3886_v3 = vsub.f32 %v3884_v42, %v3885_v36 }
 0x20f   : > { %v1272_v51 = vsub.f32 %v1192_v33, %v1256_v30  ;;  %1931 = vst.msk [vmem:[#allocation2 + $0x60] sm:$0xff] %vm427_vm0, %v1256_v30  ;;  %1370 = vperm.xlu2 %2675, %v1256_v30   ;;  %v3887_v30 = vld [vmem:[#allocation25_spill] sm:$0xff] }
 0x210   : > { %v1292_v21 = vmul.f32 1.442695, %v3886_v3  ;;  %v1270_v31 = vsub.f32 %v3887_v30, %v3465_v28  ;;  %v3890_v28 = vld [vmem:[#allocation23_spill] sm:$0xff]  ;;  %v2342_v30 = vld [vmem:[%s3572_s17 + $0x10] sm:$0xf] }
 0x211   : > { %v1300_v52 = vmul.f32 1.442695, %v1272_v51 }
 0x212   : > { %v1296_v6 = vmul.f32 1.442695, %v1270_v31  ;;  %v2535_v31 = vld [vmem:[%s3572_s17 + $0x14] sm:$0xf0] }
 0x213   : > { %2717 = vpow2.f32 %v1300_v52 }
 0x214   : > { %v1237_v23 = vpop.xlane.xlu1 %1236  ;;  %2719 = vpow2.f32 %v1276_v37 }
 0x215   : > { %v3582_v32 = vmax.f32 %v3579_v38, %v1237_v23  ;;  %2721 = vpow2.f32 %v1280_v10 }
 0x217   : > { %1932 = vst.msk [vmem:[#allocation2 + $0x68] sm:$0xff] %vm427_vm0, %v3582_v32  ;;  %1375 = vperm.xlu1 %2674, %v3582_v32  }
 0x219   : > { %v2718_v62 = vpop.eup %2717 }
 0x21a   : > { %1626 = vperm.xlu0 %2673, %v2718_v62   ;;  %v2720_v43 = vpop.eup %2719 }
 0x21b   : > { %v2722_v34 = vpop.eup %2721 }
 0x21c   : > { %v1240_v2 = vpop.xlane.xlu1 %1239 }
 0x21d   : > { %v3593_v12 = vmax.f32 %v3587_v26, %v1240_v2  ;;  %v3889_v2 = vld [vmem:[#allocation22_spill] sm:$0xff] }
 0x21f   : > { %v1243_v46 = vpop.xlane.xlu0 %1242  ;;  %1933 = vst.msk [vmem:[#allocation2 + $0x70] sm:$0xff] %vm427_vm0, %v3593_v12  ;;  %1380 = vperm.xlu2 %2675, %v3593_v12  }
 0x220   : > { %v1259_v49 = vmax.f32 %v1195_v8, %v1243_v46  ;;  %v3891_v46 = vld [vmem:[#allocation19_spill] sm:$0xff] }
 0x222   : > { %v1275_v50 = vsub.f32 %v1195_v8, %v1259_v49  ;;  %1934 = vst.msk [vmem:[#allocation2 + $0x78] sm:$0xff] %vm427_vm0, %v1259_v49  ;;  %1385 = vperm.xlu1 %2674, %v1259_v49  }
 0x224   : > { %v1306_v17 = vmul.f32 1.442695, %v1275_v50  ;;  %v3892_v50 = vld [vmem:[#allocation27_spill] sm:$0xff] }
 0x226   : > { %2723 = vpow2.f32 %v1306_v17  ;;  %v1271_v17 = vsub.f32 %v3892_v50, %v3476_v61 }
 0x227   : > { %1566 = vperm.xlu2 %2675, %v2720_v43   ;;  %2725 = vpow2.f32 %v1282_v54  ;;  %v1273_v43 = vsub.f32 %v3579_v38, %v3582_v32  ;;  %v1274_v38 = vsub.f32 %v3587_v26, %v3593_v12 }
 0x228   : > { %2727 = vpow2.f32 %v1284_v57 }
 0x229   : > { %2729 = vpow2.f32 %v1286_v11 }
 0x22a   : > { %1576 = vperm.xlu1 %2674, %v2722_v34   ;;  %2731 = vpow2.f32 %v1290_v60  ;;  %v1298_v34 = vmul.f32 1.442695, %v1271_v17  ;;  %v2358_v17 = vld [vmem:[%s3572_s17 + $0x30] sm:$0xf] }
 0x22b   : > { %2733 = vpow2.f32 %v1292_v21 }
 0x22c   : > { %v2724_v16 = vpop.eup %2723 }
 0x22d   : > { %1641 = vperm.xlu0 %2673, %v2724_v16   ;;  %v2726_v35 = vpop.eup %2725 }
 0x22e   : > { %v1356_v40 = vpop.permute.xlu2 %1355  ;;  %v2728_v5 = vpop.eup %2727 }
 0x22f   : > { %v1406_v47 = vsub.f32 %v3882_v39, %v1356_v40  ;;  %v1407_v33 = vsub.f32 %v3883_v4, %v1356_v40  ;;  %1581 = vperm.xlu2 %2675, %v2726_v35   ;;  %v2730_v62 = vpop.eup %2729  ;;  %v1302_v40 = vmul.f32 1.442695, %v1273_v43 }
 0x230   : > { %v2732_v10 = vpop.eup %2731 }
 0x231   : > { %v1428_v14 = vpack.c.bf16 %v1406_v47, %v1404_v53  ;;  %v1429_v24 = vpack.c.bf16 %v1407_v33, %v1405_v41  ;;  %v2734_v13 = vpop.eup %2733 }
 0x232   : > { %1586 = vperm.xlu1 %2674, %v2728_v5  }
 0x233   : > { %v1452_v0 = vunpack.c.l.bf16 %v1428_v14  ;;  %v1453_v7 = vunpack.c.l.bf16 %v1429_v24  ;;  %v1454_v27 = vunpack.c.h.bf16 %v1428_v14  ;;  %v1455_v25 = vunpack.c.h.bf16 %v1429_v24  ;;  %v1572_v24 = vpop.permute.xlu0 %1571 }
 0x234   : > { %v1361_v56 = vpop.permute.xlu1 %1360  ;;  %v1304_v14 = vmul.f32 1.442695, %v1274_v38 }
 0x235   : > { %v1500_v63 = vmul.f32 1.442695, %v1452_v0  ;;  %v1502_v51 = vmul.f32 1.442695, %v1453_v7  ;;  %v1504_v52 = vmul.f32 1.442695, %v1454_v27  ;;  %v1408_v37 = vsub.f32 %v3888_v20, %v1361_v56  ;;  %2678 = vset.pattern.permute.xlu0 %v2997_v58 }
 0x236   : > { %v1506_v23 = vmul.f32 1.442695, %v1455_v25  ;;  %v1366_v9 = vpop.permute.xlu2 %1365  ;;  %v1409_v49 = vsub.f32 %v3891_v46, %v1361_v56  ;;  %v2534_v0 = vld [vmem:[%s3572_s17 + $0x14] sm:$0xf]  ;;  %v1645_v27 = vmul.f32 0.0, %v1572_v24  ;;  %v2343_v25 = vor.u32 %v2535_v31, %v2342_v30 }
 0x237   : > { %2735 = vpow2.f32 %v1500_v63  ;;  %v1410_v8 = vsub.f32 %v3889_v2, %v1366_v9  ;;  %v1411_v15 = vsub.f32 %v3890_v28, %v1366_v9  ;;  %1591 = vperm.xlu2 %2675, %v2730_v62   ;;  %v2344_v63 = vld [vmem:[%s3572_s17 + $0x18] sm:$0xf0]  ;;  %v2537_v2 = vld [vmem:[%s3572_s17 + $0x24] sm:$0xf0]  ;;  %v2540_v31 = vld [vmem:[%s3572_s17 + $0x44] sm:$0xf] }
 0x238   : > { %2737 = vpow2.f32 %v1502_v51  ;;  %729 = vmatmul.bf16.gmra.mxu0 %v2343_v25  ;;  %v2541_v30 = vld [vmem:[%s3572_s17 + $0x44] sm:$0xf0] }
 0x239   : > { %2739 = vpow2.f32 %v1504_v52  ;;  %v1430_v48 = vpack.c.bf16 %v1410_v8, %v1408_v37  ;;  %v1431_v54 = vpack.c.bf16 %v1411_v15, %v1409_v49  ;;  %v2347_v52 = vor.u32 %v2534_v0, %v2344_v63  ;;  %v2350_v37 = vld [vmem:[%s3572_s17 + $0x20] sm:$0xf]  ;;  %v2536_v8 = vld [vmem:[%s3572_s17 + $0x24] sm:$0xf]  ;;  %v2352_v15 = vld [vmem:[%s3572_s17 + $0x28] sm:$0xf0] }
 0x23a   : > { %2741 = vpow2.f32 %v1506_v23  ;;  %1601 = vperm.xlu1 %2674, %v2732_v10   ;;  %v2351_v28 = vor.u32 %v2537_v2, %v2350_v37  ;;  %v2355_v10 = vor.u32 %v2536_v8, %v2352_v15 }
 0x23b   : > { %2743 = vpow2.f32 %v1296_v6  ;;  %v1456_v16 = vunpack.c.l.bf16 %v1430_v48  ;;  %v1457_v55 = vunpack.c.l.bf16 %v1431_v54  ;;  %v1458_v61 = vunpack.c.h.bf16 %v1430_v48  ;;  %778 = vmatmul.bf16.gmra.mxu1 %v2347_v52  ;;  %v2539_v48 = vld [vmem:[%s3572_s17 + $0x34] sm:$0xf0] }
 0x23c   : > { %v1459_v45 = vunpack.c.h.bf16 %v1431_v54  ;;  %2745 = vpow2.f32 %v1298_v34  ;;  %v2538_v54 = vld [vmem:[%s3572_s17 + $0x34] sm:$0xf] }
 0x23d   : > { %v2736_v57 = vpop.eup %2735  ;;  %v1508_v32 = vmul.f32 1.442695, %v1456_v16  ;;  %v1510_v47 = vmul.f32 1.442695, %v1457_v55  ;;  %2747 = vpow2.f32 %v1302_v40  ;;  %v1512_v33 = vmul.f32 1.442695, %v1458_v61 }
 0x23e   : > { %v2738_v11 = vpop.eup %2737  ;;  %v3633_v41 = vpop.f32.mrf.mxu2  ;;  %v1514_v5 = vmul.f32 1.442695, %v1459_v45 }
 0x23f   : > { %v2740_v60 = vpop.eup %2739  ;;  %1606 = vperm.xlu2 %2675, %v2734_v13   ;;  %v3635_v4 = vpop.f32.mrf.mxu3  ;;  %2749 = vpow2.f32 %v1508_v32  ;;  %v2359_v13 = vor.u32 %v2539_v48, %v2358_v17 }
 0x240   : > { %v2742_v35 = vpop.eup %2741  ;;  %v1540_v53 = vpack.c.bf16 %v2740_v60, %v2736_v57  ;;  %2751 = vpow2.f32 %v1510_v47  ;;  %v2360_v57 = vld [vmem:[%s3572_s17 + $0x38] sm:$0xf0]  ;;  %v1847_v55 = vadd.f32 %v3635_v4, %v3633_v41 }
 0x241   : > { %v2744_v59 = vpop.eup %2743  ;;  %v1541_v39 = vpack.c.bf16 %v2742_v35, %v2738_v11  ;;  %2753 = vpow2.f32 %v1512_v33  ;;  %v2363_v34 = vor.u32 %v2538_v54, %v2360_v57 }
 0x242   : > { %1816 = vmatmul.bf16.gmra.mxu2 %v1540_v53  ;;  %1616 = vperm.xlu1 %2674, %v2744_v59   ;;  %v2746_v26 = vpop.eup %2745  ;;  %2755 = vpow2.f32 %v1514_v5  ;;  %v3893_v53 = vld [vmem:[#allocation30_spill] sm:$0xff] }
 0x243   : > { %1865 = vmatmul.bf16.gmra.mxu3 %v1541_v39  ;;  %v2748_v12 = vpop.eup %2747  ;;  %2757 = vpow2.f32 %v1304_v14  ;;  %v3894_v39 = vld [vmem:[#allocation31_spill] sm:$0xff] }
 0x245   : > { %v2750_v3 = vpop.eup %2749 }
 0x246   : > { %v1799_v42 = vpop.f32.mrf.mxu2  ;;  %v2752_v7 = vpop.eup %2751 }
 0x247   : > { %1621 = vperm.xlu2 %2675, %v2746_v26   ;;  %v1848_v36 = vpop.f32.mrf.mxu3  ;;  %v2754_v51 = vpop.eup %2753 }
 0x248   : > { %v1849_v21 = vadd.f32 %v1848_v36, %v1799_v42  ;;  %v2756_v56 = vpop.eup %2755  ;;  %v1542_v9 = vpack.c.bf16 %v2754_v51, %v2750_v3  ;;  %734 = vmatmul.bf16.gmra.mxu0 %v2351_v28 }
 0x249   : > { %v2758_v23 = vpop.eup %2757  ;;  %v1543_v62 = vpack.c.bf16 %v2756_v56, %v2752_v7 }
 0x24a   : > { %1631 = vperm.xlu1 %2674, %v2748_v12   ;;  %v3641_v6 = vadd.f32 %v1849_v21, %v1645_v27  ;;  %v2366_v21 = vld [vmem:[%s3572_s17 + $0x40] sm:$0xf] }
 0x24b   : > { %783 = vmatmul.bf16.gmra.mxu1 %v2355_v10 }
 0x24c   : > { %2759 = vrcp.f32 %v3641_v6 }
 0x24e   : > { %v3648_v46 = vpop.f32.mrf.mxu2 }
 0x24f   : > { %1636 = vperm.xlu2 %2675, %v2758_v23   ;;  %v3650_v49 = vpop.f32.mrf.mxu3 }
 0x252   : > { %1821 = vmatmul.bf16.gmra.mxu2 %v1542_v9  ;;  %2676 = vset.pattern.permute.xlu1 %v2997_v58  ;;  %v2760_v20 = vpop.eup %2759 }
 0x253   : > { %1870 = vmatmul.bf16.gmra.mxu3 %v1543_v62 }
 0x256   : > { %v1804_v16 = vpop.f32.mrf.mxu2 }
 0x257   : > { %2677 = vset.pattern.permute.xlu2 %v2997_v58  ;;  %v1853_v58 = vpop.f32.mrf.mxu3 }
 0x258   : > { %1977 = vperm.xlu2 %2677, %v2760_v20   ;;  %739 = vmatmul.bf16.gmra.mxu0 %v2359_v13  ;;  %v1854_v45 = vadd.f32 %v1853_v58, %v1804_v16 }
 0x25b   : > { %788 = vmatmul.bf16.gmra.mxu1 %v2363_v34 }
 0x25e   : > { %v3662_v61 = vpop.f32.mrf.mxu2 }
 0x25f   : > { %v3664_v35 = vpop.f32.mrf.mxu3 }
 0x266   : > { %v1809_v0 = vpop.f32.mrf.mxu2 }
 0x267   : > { %v1858_v7 = vpop.f32.mrf.mxu3 }
 0x268   : > { %v1859_v23 = vadd.f32 %v1858_v7, %v1809_v0 }
 0x269   : > { %v1371_v50 = vpop.permute.xlu2 %1370 }
 0x26a   : > { %v1412_v59 = vsub.f32 %v3893_v53, %v1371_v50  ;;  %v1413_v47 = vsub.f32 %v3894_v39, %v1371_v50 }
 0x279   : > { %v3655_v43 = vpop.permute.xlu2 %1380 }
 0x27a   : > { %v1416_v37 = vsub.f32 %v3528_v1, %v3655_v43  ;;  %v1417_v2 = vsub.f32 %v3530_v18, %v3655_v43 }
 0x27e   : > { %v725_v62 = vpop.f32.mrf.mxu0 }
 0x281   : > { %v1567_v11 = vpop.permute.xlu2 %1566 }
 0x282   : > { %v1644_v60 = vmul.f32 0.0, %v1567_v11 }
 0x284   : > { %v3660_v40 = vadd.f32 %v1847_v55, %v1644_v60 }
 0x286   : > { %2761 = vrcp.f32 %v3660_v40  ;;  %v774_v20 = vpop.f32.mrf.mxu1 }
 0x287   : > { %v3682_v28 = vadd.f32 %v774_v20, %v725_v62 }
 0x289   : > { %v1376_v38 = vpop.permute.xlu1 %1375  ;;  %v1582_v32 = vpop.permute.xlu2 %1581 }
 0x28a   : > { %v1414_v41 = vsub.f32 %v3520_v44, %v1376_v38  ;;  %v1415_v4 = vsub.f32 %v3522_v29, %v1376_v38  ;;  %v1647_v33 = vmul.f32 0.0, %v1582_v32  ;;  %v2367_v44 = vor.u32 %v2541_v30, %v2366_v21  ;;  %v2368_v29 = vld [vmem:[%s3572_s17 + $0x48] sm:$0xf0]  ;;  %v1812_v32 = vpop.f32.mrf.mxu2 }
 0x28b   : > { %v2371_v51 = vor.u32 %v2540_v31, %v2368_v29 }
 0x28c   : > { %v2762_v5 = vpop.eup %2761  ;;  %v1432_v14 = vpack.c.bf16 %v1414_v41, %v1412_v59  ;;  %v1433_v26 = vpack.c.bf16 %v1415_v4, %v1413_v47  ;;  %v3671_v12 = vadd.f32 %v1854_v45, %v1647_v33  ;;  %744 = vmatmul.bf16.gmra.mxu0 %v2367_v44  ;;  %v1852_v45 = vadd.f32 %v3650_v49, %v3648_v46  ;;  %v1861_v41 = vpop.f32.mrf.mxu3 }
 0x28d   : > { %1972 = vperm.xlu1 %2676, %v2762_v5   ;;  %793 = vmatmul.bf16.gmra.mxu1 %v2371_v51  ;;  %v1857_v49 = vadd.f32 %v3664_v35, %v3662_v61  ;;  %v727_v51 = vpop.f32.mrf.mxu0 }
 0x28e   : > { %v1460_v24 = vunpack.c.l.bf16 %v1432_v14  ;;  %v1461_v42 = vunpack.c.l.bf16 %v1433_v26  ;;  %v1462_v36 = vunpack.c.h.bf16 %v1432_v14  ;;  %v1463_v3 = vunpack.c.h.bf16 %v1433_v26 }
 0x28f   : > { %2763 = vrcp.f32 %v3671_v12 }
 0x290   : > { %v1516_v27 = vmul.f32 1.442695, %v1460_v24  ;;  %v1518_v25 = vmul.f32 1.442695, %v1461_v42  ;;  %v1520_v63 = vmul.f32 1.442695, %v1462_v36  ;;  %v1597_v24 = vpop.permute.xlu0 %1596 }
 0x291   : > { %v1522_v52 = vmul.f32 1.442695, %v1463_v3  ;;  %v1592_v56 = vpop.permute.xlu2 %1591  ;;  %v1862_v3 = vadd.f32 %v1861_v41, %v1812_v32  ;;  %v1650_v0 = vmul.f32 0.0, %v1597_v24 }
 0x292   : > { %2765 = vpow2.f32 %v1516_v27  ;;  %v1649_v9 = vmul.f32 0.0, %v1592_v56  ;;  %v1814_v30 = vpop.f32.mrf.mxu2 }
 0x293   : > { %2767 = vpow2.f32 %v1518_v25  ;;  %v3705_v29 = vadd.f32 %v1862_v3, %v1650_v0 }
 0x294   : > { %v1386_v8 = vpop.permute.xlu1 %1385  ;;  %2769 = vpow2.f32 %v1520_v63  ;;  %v3684_v15 = vadd.f32 %v1859_v23, %v1649_v9  ;;  %v1863_v7 = vpop.f32.mrf.mxu3 }
 0x295   : > { %v1418_v10 = vsub.f32 %v3532_v19, %v1386_v8  ;;  %v1419_v50 = vsub.f32 %v3534_v22, %v1386_v8  ;;  %v2764_v17 = vpop.eup %2763  ;;  %2771 = vpow2.f32 %v1522_v52  ;;  %v1864_v27 = vadd.f32 %v1863_v7, %v1814_v30  ;;  %v776_v52 = vpop.f32.mrf.mxu1  ;;  %v2545_v30 = vld [vmem:[%s3572_s17 + $0x64] sm:$0xf0]  ;;  %v2384_v7 = vld [vmem:[%s3572_s17 + $0x68] sm:$0xf0] }
 0x296   : > { %2773 = vrcp.f32 %v3684_v15  ;;  %1987 = vperm.xlu1 %2676, %v2764_v17   ;;  %v777_v9 = vadd.f32 %v776_v52, %v727_v51  ;;  %v2374_v17 = vld [vmem:[%s3572_s17 + $0x50] sm:$0xf] }
 0x297   : > { %v1434_v48 = vpack.c.bf16 %v1418_v10, %v1416_v37  ;;  %v1435_v1 = vpack.c.bf16 %v1419_v50, %v1417_v2  ;;  %v2390_v52 = vld [vmem:[%s3572_s17 + $0x70] sm:$0xf] }
 0x298   : > { %v2766_v54 = vpop.eup %2765  ;;  %v2083_v20 = vmax.f32 %v777_v9, 0.0  ;;  %v2546_v9 = vld [vmem:[%s3572_s17 + $0x74] sm:$0xf] }
 0x299   : > { %v1464_v18 = vunpack.c.l.bf16 %v1434_v48  ;;  %v2768_v43 = vpop.eup %2767  ;;  %v1465_v13 = vunpack.c.l.bf16 %v1435_v1  ;;  %v3689_v57 = vpop.permute.xlu2 %1606  ;;  %v1466_v16 = vunpack.c.h.bf16 %v1434_v48  ;;  %v1467_v11 = vunpack.c.h.bf16 %v1435_v1  ;;  %v2543_v48 = vld [vmem:[%s3572_s17 + $0x54] sm:$0xf0]  ;;  %v2542_v1 = vld [vmem:[%s3572_s17 + $0x54] sm:$0xf] }
 0x29a   : > { %v2770_v34 = vpop.eup %2769 }
 0x29b   : > { %v2772_v58 = vpop.eup %2771  ;;  %v1524_v19 = vmul.f32 1.442695, %v1464_v18  ;;  %v1544_v55 = vpack.c.bf16 %v2770_v34, %v2766_v54  ;;  %v1526_v38 = vmul.f32 1.442695, %v1465_v13  ;;  %v1528_v39 = vmul.f32 1.442695, %v1466_v16 }
 0x29c   : > { %v1577_v22 = vpop.permute.xlu1 %1576  ;;  %v2774_v60 = vpop.eup %2773  ;;  %v1545_v53 = vpack.c.bf16 %v2772_v58, %v2768_v43  ;;  %v1530_v4 = vmul.f32 1.442695, %v1467_v11  ;;  %v2375_v54 = vor.u32 %v2543_v48, %v2374_v17  ;;  %v2376_v18 = vld [vmem:[%s3572_s17 + $0x58] sm:$0xf0]  ;;  %v1652_v34 = vmul.f32 0.0, %v3689_v57 }
 0x29d   : > { %v1646_v59 = vmul.f32 0.0, %v1577_v22  ;;  %1826 = vmatmul.bf16.gmra.mxu2 %v1544_v55  ;;  %2775 = vpow2.f32 %v1524_v19  ;;  %v2379_v43 = vor.u32 %v2542_v1, %v2376_v18  ;;  %v1612_v11 = vpop.permute.xlu0 %1611 }
 0x29e   : > { %1875 = vmatmul.bf16.gmra.mxu3 %v1545_v53  ;;  %1997 = vperm.xlu1 %2676, %v2774_v60   ;;  %v1653_v22 = vmul.f32 0.0, %v1612_v11 }
 0x29f   : > { %v3693_v47 = vadd.f32 %v1852_v45, %v1646_v59  ;;  %749 = vmatmul.bf16.gmra.mxu0 %v2375_v54  ;;  %798 = vmatmul.bf16.gmra.mxu1 %v2379_v43 }
 0x2a1   : > { %2777 = vrcp.f32 %v3693_v47  ;;  %v3696_v33 = vpop.permute.xlu2 %1621 }
 0x2a2   : > { %2779 = vpow2.f32 %v1526_v38 }
 0x2a3   : > { %2781 = vpow2.f32 %v1528_v39  ;;  %v2776_v14 = vpop.eup %2775 }
 0x2a4   : > { %2783 = vpow2.f32 %v1530_v4  ;;  %v1587_v46 = vpop.permute.xlu1 %1586 }
 0x2a5   : > { %v1648_v5 = vmul.f32 0.0, %v1587_v46 }
 0x2a7   : > { %v2778_v26 = vpop.eup %2777  ;;  %v3700_v42 = vadd.f32 %v1857_v49, %v1648_v5  ;;  %v1655_v5 = vmul.f32 0.0, %v3696_v33 }
 0x2a8   : > { %v2780_v36 = vpop.eup %2779  ;;  %1982 = vperm.xlu0 %2678, %v2778_v26  }
 0x2a9   : > { %v2782_v21 = vpop.eup %2781  ;;  %2785 = vrcp.f32 %v3700_v42  ;;  %v3703_v44 = vpop.permute.xlu2 %1636 }
 0x2aa   : > { %v2784_v31 = vpop.eup %2783  ;;  %v1546_v61 = vpack.c.bf16 %v2782_v21, %v2776_v14  ;;  %2787 = vrcp.f32 %v3705_v29  ;;  %v2382_v21 = vld [vmem:[%s3572_s17 + $0x60] sm:$0xf] }
 0x2ab   : > { %v1547_v25 = vpack.c.bf16 %v2784_v31, %v2780_v36  ;;  %v2544_v31 = vld [vmem:[%s3572_s17 + $0x64] sm:$0xf]  ;;  %v2383_v0 = vor.u32 %v2545_v30, %v2382_v21 }
 0x2ac   : > { %v1602_v35 = vpop.permute.xlu1 %1601  ;;  %v2387_v33 = vor.u32 %v2544_v31, %v2384_v7 }
 0x2ad   : > { %v1651_v63 = vmul.f32 0.0, %v1602_v35  ;;  %1831 = vmatmul.bf16.gmra.mxu2 %v1546_v61 }
 0x2ae   : > { %1880 = vmatmul.bf16.gmra.mxu3 %v1547_v25 }
 0x2af   : > { %v2786_v56 = vpop.eup %2785  ;;  %v3707_v23 = vadd.f32 %v1864_v27, %v1651_v63  ;;  %754 = vmatmul.bf16.gmra.mxu0 %v2383_v0  ;;  %803 = vmatmul.bf16.gmra.mxu1 %v2387_v33 }
 0x2b0   : > { %1992 = vperm.xlu2 %2677, %v2786_v56   ;;  %v2788_v2 = vpop.eup %2787  ;;  %v2547_v56 = vld [vmem:[%s3572_s17 + $0x74] sm:$0xf0] }
 0x2b1   : > { %2789 = vrcp.f32 %v3707_v23 }
 0x2b2   : > { %v1978_v62 = vpop.permute.xlu2 %1977 }
 0x2b3   : > { %v2051_v37 = vmul.f32 %v1978_v62, %v3641_v6  ;;  %v2391_v62 = vor.u32 %v2547_v56, %v2390_v52 }
 0x2b4   : > { %v1617_v59 = vpop.permute.xlu1 %1616 }
 0x2b5   : > { %v2099_v8 = vmax.f32 %v2051_v37, 0.0  ;;  %v1654_v57 = vmul.f32 0.0, %v1617_v59  ;;  %v730_v36 = vpop.f32.mrf.mxu0 }
 0x2b7   : > { %v2790_v10 = vpop.eup %2789  ;;  %v2115_v50 = vadd.f32 %v2099_v8, %v2083_v20  ;;  %v2392_v20 = vld [vmem:[%s3572_s17 + $0x78] sm:$0xf0]  ;;  %v2082_v8 = vmax.f32 %v3682_v28, 0.0 }
 0x2b8   : > { %2007 = vperm.xlu0 %2678, %v2790_v10   ;;  %2002 = vperm.xlu2 %2677, %v2788_v2   ;;  %v779_v3 = vpop.f32.mrf.mxu1  ;;  %v2395_v37 = vor.u32 %v2546_v9, %v2392_v20 }
 0x2b9   : > { %2131 = vst [vmem:[%s3717_s19 + $0x8] sm:$0xff] %v2115_v50 }
 0x2bc   : > { %v3738_v25 = vpop.permute.xlu1 %1631 }
 0x2bd   : > { %v732_v35 = vpop.f32.mrf.mxu0 }
 0x2bf   : > { %759 = vmatmul.bf16.gmra.mxu0 %v2391_v62  ;;  %808 = vmatmul.bf16.gmra.mxu1 %v2395_v37 }
 0x2c0   : > { %v781_v27 = vpop.f32.mrf.mxu1 }
 0x2c1   : > { %v782_v54 = vadd.f32 %v781_v27, %v732_v35 }
 0x2c5   : > { %v1817_v13 = vpop.f32.mrf.mxu2  ;;  %v735_v63 = vpop.f32.mrf.mxu0 }
 0x2c6   : > { %v1866_v6 = vpop.f32.mrf.mxu3 }
 0x2c7   : > { %v1867_v16 = vadd.f32 %v1866_v6, %v1817_v13  ;;  %v1627_v13 = vpop.permute.xlu0 %1626  ;;  %v2085_v6 = vmax.f32 %v782_v54, 0.0 }
 0x2c8   : > { %v784_v51 = vpop.f32.mrf.mxu1 }
 0x2c9   : > { %v3721_v58 = vadd.f32 %v1867_v16, %v1652_v34  ;;  %v785_v18 = vadd.f32 %v784_v51, %v735_v63  ;;  %v1656_v63 = vmul.f32 0.0, %v1627_v13 }
 0x2cb   : > { %2791 = vrcp.f32 %v3721_v58  ;;  %v2086_v11 = vmax.f32 %v785_v18, 0.0 }
 0x2cd   : > { %v1819_v19 = vpop.f32.mrf.mxu2  ;;  %v737_v50 = vpop.f32.mrf.mxu0 }
 0x2ce   : > { %v1868_v55 = vpop.f32.mrf.mxu3 }
 0x2cf   : > { %v1869_v60 = vadd.f32 %v1868_v55, %v1819_v19 }
 0x2d0   : > { %v786_v17 = vpop.f32.mrf.mxu1 }
 0x2d1   : > { %v2792_v45 = vpop.eup %2791  ;;  %v3724_v53 = vadd.f32 %v1869_v60, %v1653_v22 }
 0x2d2   : > { %2012 = vperm.xlu1 %2676, %v2792_v45   ;;  %v787_v45 = vadd.f32 %v786_v17, %v737_v50 }
 0x2d3   : > { %2793 = vrcp.f32 %v3724_v53 }
 0x2d5   : > { %v1822_v38 = vpop.f32.mrf.mxu2 }
 0x2d6   : > { %v1871_v32 = vpop.f32.mrf.mxu3 }
 0x2d7   : > { %v1872_v39 = vadd.f32 %v1871_v32, %v1822_v38 }
 0x2d8   : > { %v789_v55 = vpop.f32.mrf.mxu1 }
 0x2d9   : > { %v2794_v41 = vpop.eup %2793  ;;  %v3727_v4 = vadd.f32 %v1872_v39, %v1654_v57  ;;  %v1642_v57 = vpop.permute.xlu0 %1641  ;;  %v2087_v39 = vmax.f32 %v787_v45, 0.0 }
 0x2da   : > { %2017 = vperm.xlu2 %2677, %v2794_v41  }
 0x2db   : > { %2795 = vrcp.f32 %v3727_v4 }
 0x2dd   : > { %v1824_v46 = vpop.f32.mrf.mxu2 }
 0x2de   : > { %v1873_v49 = vpop.f32.mrf.mxu3 }
 0x2df   : > { %v1874_v14 = vadd.f32 %v1873_v49, %v1824_v46 }
 0x2e0   : > { %v791_v0 = vpop.f32.mrf.mxu1 }
 0x2e1   : > { %v2796_v26 = vpop.eup %2795  ;;  %v3731_v24 = vadd.f32 %v1874_v14, %v1655_v5 }
 0x2e2   : > { %2022 = vperm.xlu0 %2678, %v2796_v26   ;;  %v780_v26 = vadd.f32 %v779_v3, %v730_v36 }
 0x2e3   : > { %2797 = vrcp.f32 %v3731_v24 }
 0x2e4   : > { %v2084_v7 = vmax.f32 %v780_v26, 0.0 }
 0x2e9   : > { %v2798_v61 = vpop.eup %2797 }
 0x2ea   : > { %2027 = vperm.xlu1 %2676, %v2798_v61  }
 0x2ff   : > { %v1973_v2 = vpop.permute.xlu1 %1972 }
 0x300   : > { %v2050_v10 = vmul.f32 %v1973_v2, %v3660_v40  ;;  %v740_v40 = vpop.f32.mrf.mxu0 }
 0x301   : > { %v790_v38 = vadd.f32 %v789_v55, %v740_v40 }
 0x302   : > { %v2098_v48 = vmax.f32 %v2050_v10, 0.0 }
 0x303   : > { %v2088_v46 = vmax.f32 %v790_v38, 0.0 }
 0x304   : > { %v2114_v1 = vadd.f32 %v2098_v48, %v2082_v8 }
 0x306   : > { %2130 = vst [vmem:[%s3717_s19] sm:$0xff] %v2114_v1 }
 0x308   : > { %v1988_v43 = vpop.permute.xlu1 %1987  ;;  %v742_v30 = vpop.f32.mrf.mxu0 }
 0x309   : > { %v2053_v34 = vmul.f32 %v1988_v43, %v3671_v12  ;;  %v792_v36 = vadd.f32 %v791_v0, %v742_v30 }
 0x30a   : > { %v1993_v16 = vpop.permute.xlu2 %1992  ;;  %v794_v52 = vpop.f32.mrf.mxu1 }
 0x30b   : > { %v2054_v28 = vmul.f32 %v1993_v16, %v3700_v42  ;;  %v2101_v19 = vmax.f32 %v2053_v34, 0.0  ;;  %v2089_v20 = vmax.f32 %v792_v36, 0.0 }
 0x30d   : > { %v2102_v22 = vmax.f32 %v2054_v28, 0.0  ;;  %v2117_v60 = vadd.f32 %v2101_v19, %v2085_v6 }
 0x30f   : > { %v2118_v59 = vadd.f32 %v2102_v22, %v2086_v11  ;;  %2133 = vst [vmem:[%s3717_s19 + $0x18] sm:$0xff] %v2117_v60  ;;  %v1659_v22 = vmul.f32 0.0, %v1642_v57 }
 0x310   : > { %v1998_v32 = vpop.permute.xlu1 %1997  ;;  %v745_v51 = vpop.f32.mrf.mxu0 }
 0x311   : > { %2134 = vst [vmem:[%s3717_s19 + $0x20] sm:$0xff] %v2118_v59  ;;  %v2055_v12 = vmul.f32 %v1998_v32, %v3684_v15  ;;  %v795_v59 = vadd.f32 %v794_v52, %v745_v51 }
 0x312   : > { %v2003_v41 = vpop.permute.xlu2 %2002  ;;  %v796_v48 = vpop.f32.mrf.mxu1 }
 0x313   : > { %v2056_v42 = vmul.f32 %v2003_v41, %v3705_v29  ;;  %v2103_v49 = vmax.f32 %v2055_v12, 0.0 }
 0x315   : > { %v2104_v5 = vmax.f32 %v2056_v42, 0.0  ;;  %v2119_v14 = vadd.f32 %v2103_v49, %v2087_v39  ;;  %v2090_v39 = vmax.f32 %v795_v59, 0.0 }
 0x317   : > { %v2120_v21 = vadd.f32 %v2104_v5, %v2088_v46  ;;  %2135 = vst [vmem:[%s3717_s19 + $0x28] sm:$0xff] %v2119_v14 }
 0x318   : > { %v747_v17 = vpop.f32.mrf.mxu0 }
 0x319   : > { %2136 = vst [vmem:[%s3717_s19 + $0x30] sm:$0xff] %v2120_v21  ;;  %v797_v18 = vadd.f32 %v796_v48, %v747_v17 }
 0x31a   : > { %v1983_v31 = vpop.permute.xlu0 %1982 }
 0x31b   : > { %v2052_v61 = vmul.f32 %v1983_v31, %v3693_v47  ;;  %v1657_v47 = vmul.f32 0.0, %v3738_v25  ;;  %v1658_v25 = vmul.f32 0.0, %v3703_v44  ;;  %v2091_v16 = vmax.f32 %v797_v18, 0.0 }
 0x31c   : > { %v799_v42 = vpop.f32.mrf.mxu1 }
 0x31d   : > { %v2100_v33 = vmax.f32 %v2052_v61, 0.0 }
 0x31f   : > { %v2116_v15 = vadd.f32 %v2100_v33, %v2084_v7 }
 0x320   : > { %v1827_v35 = vpop.f32.mrf.mxu2  ;;  %v750_v46 = vpop.f32.mrf.mxu0 }
 0x321   : > { %2132 = vst [vmem:[%s3717_s19 + $0x10] sm:$0xff] %v2116_v15  ;;  %v1876_v27 = vpop.f32.mrf.mxu3  ;;  %v800_v57 = vadd.f32 %v799_v42, %v750_v46 }
 0x322   : > { %v1877_v29 = vadd.f32 %v1876_v27, %v1827_v35 }
 0x323   : > { %v2092_v5 = vmax.f32 %v800_v57, 0.0 }
 0x324   : > { %v3757_v56 = vadd.f32 %v1877_v29, %v1656_v63  ;;  %v801_v21 = vpop.f32.mrf.mxu1 }
 0x326   : > { %2799 = vrcp.f32 %v3757_v56 }
 0x328   : > { %v1829_v3 = vpop.f32.mrf.mxu2  ;;  %v752_v26 = vpop.f32.mrf.mxu0 }
 0x329   : > { %v1878_v9 = vpop.f32.mrf.mxu3  ;;  %v802_v0 = vadd.f32 %v801_v21, %v752_v26 }
 0x32a   : > { %v2008_v62 = vpop.permute.xlu0 %2007  ;;  %v1879_v37 = vadd.f32 %v1878_v9, %v1829_v3 }
 0x32b   : > { %v2057_v2 = vmul.f32 %v2008_v62, %v3707_v23  ;;  %v2093_v7 = vmax.f32 %v802_v0, 0.0 }
 0x32c   : > { %v2800_v8 = vpop.eup %2799  ;;  %v3762_v10 = vadd.f32 %v1879_v37, %v1657_v47  ;;  %v804_v27 = vpop.f32.mrf.mxu1 }
 0x32d   : > { %v2105_v50 = vmax.f32 %v2057_v2, 0.0  ;;  %2032 = vperm.xlu2 %2677, %v2800_v8  }
 0x32e   : > { %2801 = vrcp.f32 %v3762_v10 }
 0x32f   : > { %v2121_v1 = vadd.f32 %v2105_v50, %v2089_v20 }
 0x330   : > { %v1832_v54 = vpop.f32.mrf.mxu2  ;;  %v755_v35 = vpop.f32.mrf.mxu0 }
 0x331   : > { %2137 = vst [vmem:[%s3717_s19 + $0x38] sm:$0xff] %v2121_v1  ;;  %v1881_v43 = vpop.f32.mrf.mxu3  ;;  %v805_v63 = vadd.f32 %v804_v27, %v755_v35 }
 0x332   : > { %v1882_v13 = vadd.f32 %v1881_v43, %v1832_v54 }
 0x333   : > { %v2094_v52 = vmax.f32 %v805_v63, 0.0 }
 0x334   : > { %v2018_v6 = vpop.permute.xlu2 %2017  ;;  %v2802_v23 = vpop.eup %2801  ;;  %v3767_v34 = vadd.f32 %v1882_v13, %v1658_v25 }
 0x335   : > { %v2059_v11 = vmul.f32 %v2018_v6, %v3724_v53  ;;  %2037 = vperm.xlu0 %2678, %v2802_v23   ;;  %v806_v51 = vpop.f32.mrf.mxu1 }
 0x336   : > { %2803 = vrcp.f32 %v3767_v34 }
 0x337   : > { %v2107_v28 = vmax.f32 %v2059_v11, 0.0 }
 0x338   : > { %v1834_v40 = vpop.f32.mrf.mxu2  ;;  %v757_v29 = vpop.f32.mrf.mxu0 }
 0x339   : > { %v2123_v19 = vadd.f32 %v2107_v28, %v2091_v16  ;;  %v1883_v55 = vpop.f32.mrf.mxu3  ;;  %v807_v1 = vadd.f32 %v806_v51, %v757_v29 }
 0x33a   : > { %v1884_v60 = vadd.f32 %v1883_v55, %v1834_v40 }
 0x33b   : > { %2139 = vst [vmem:[%s3717_s19 + $0x48] sm:$0xff] %v2123_v19  ;;  %v2095_v18 = vmax.f32 %v807_v1, 0.0 }
 0x33c   : > { %v2804_v44 = vpop.eup %2803  ;;  %v1901_v45 = vadd.f32 %v1884_v60, %v1659_v22 }
 0x33d   : > { %2042 = vperm.xlu1 %2676, %v2804_v44   ;;  %v809_v47 = vpop.f32.mrf.mxu1 }
 0x33e   : > { %2805 = vrcp.f32 %v1901_v45 }
 0x340   : > { %v760_v62 = vpop.f32.mrf.mxu0 }
 0x341   : > { %v810_v13 = vadd.f32 %v809_v47, %v760_v62 }
 0x343   : > { %v2096_v16 = vmax.f32 %v810_v13, 0.0 }
 0x344   : > { %v2013_v38 = vpop.permute.xlu1 %2012  ;;  %v2806_v32 = vpop.eup %2805 }
 0x345   : > { %v2058_v53 = vmul.f32 %v2013_v38, %v3721_v58  ;;  %2047 = vperm.xlu2 %2677, %v2806_v32   ;;  %v811_v20 = vpop.f32.mrf.mxu1 }
 0x347   : > { %v2106_v12 = vmax.f32 %v2058_v53, 0.0 }
 0x349   : > { %v2122_v41 = vadd.f32 %v2106_v12, %v2090_v39 }
 0x34b   : > { %2138 = vst [vmem:[%s3717_s19 + $0x40] sm:$0xff] %v2122_v41 }
 0x354   : > { %v2023_v49 = vpop.permute.xlu0 %2022 }
 0x355   : > { %v2060_v14 = vmul.f32 %v2023_v49, %v3727_v4 }
 0x357   : > { %v2108_v30 = vmax.f32 %v2060_v14, 0.0 }
 0x359   : > { %v2124_v31 = vadd.f32 %v2108_v30, %v2092_v5 }
 0x35b   : > { %2140 = vst [vmem:[%s3717_s19 + $0x50] sm:$0xff] %v2124_v31 }
 0x35c   : > { %v2028_v58 = vpop.permute.xlu1 %2027 }
 0x35d   : > { %v2061_v61 = vmul.f32 %v2028_v58, %v3731_v24  ;;  %v762_v24 = vpop.f32.mrf.mxu0 }
 0x35e   : > { %v812_v37 = vadd.f32 %v811_v20, %v762_v24 }
 0x35f   : > { %v2109_v33 = vmax.f32 %v2061_v61, 0.0 }
 0x360   : > { %v2097_v8 = vmax.f32 %v812_v37, 0.0 }
 0x361   : > { %v2125_v15 = vadd.f32 %v2109_v33, %v2093_v7 }
 0x363   : > { %2141 = vst [vmem:[%s3717_s19 + $0x58] sm:$0xff] %v2125_v15 }
 0x387   : > { %v2033_v4 = vpop.permute.xlu2 %2032 }
 0x388   : > { %v2062_v36 = vmul.f32 %v2033_v4, %v3757_v56 }
 0x38a   : > { %v2110_v3 = vmax.f32 %v2062_v36, 0.0 }
 0x38c   : > { %v2126_v9 = vadd.f32 %v2110_v3, %v2094_v52 }
 0x38e   : > { %2142 = vst [vmem:[%s3717_s19 + $0x60] sm:$0xff] %v2126_v9 }
 0x39f   : > { %v2048_v2 = vpop.permute.xlu2 %2047 }
 0x3a0   : > { %v2065_v50 = vmul.f32 %v2048_v2, %v1901_v45 }
 0x3a2   : > { %v2113_v17 = vmax.f32 %v2065_v50, 0.0 }
 0x3a4   : > { %v2129_v48 = vadd.f32 %v2113_v17, %v2097_v8 }
 0x3a6   : > { %2145 = vst [vmem:[%s3717_s19 + $0x78] sm:$0xff] %v2129_v48 }
 0x3a7   : > { %v2038_v54 = vpop.permute.xlu0 %2037 }
 0x3a8   : > { %v2063_v56 = vmul.f32 %v2038_v54, %v3762_v10 }
 0x3aa   : > { %v2111_v43 = vmax.f32 %v2063_v56, 0.0 }
 0x3ac   : > { %v2127_v25 = vadd.f32 %v2111_v43, %v2095_v18 }
 0x3ae   : > { %2143 = vst [vmem:[%s3717_s19 + $0x68] sm:$0xff] %v2127_v25 }
 0x3af   : > { %v2043_v6 = vpop.permute.xlu1 %2042 }
 0x3b0   : > { %v2064_v23 = vmul.f32 %v2043_v6, %v3767_v34 }
 0x3b2   : > { %v2112_v10 = vmax.f32 %v2064_v23, 0.0 }
 0x3b4   : > { %v2128_v11 = vadd.f32 %v2112_v10, %v2096_v16 }
 0x3b6   : > { %2144 = vst [vmem:[%s3717_s19 + $0x70] sm:$0xff] %v2128_v11 }
 0x3b7   : > { %2924 = shalt.err (!%p2921_p3)
}
 0x3b8   : > { %s2998_s3 = smov 128   ;;  %s2999_s16 = smov 8  }
 0x3b9   : > { %2591 = dma.vmem_to_hbm [thread:$0]  (%p3114_p7), %s2160_s20, 2048, %s2162_s28, %s2147_s24, %s2998_s3, %s2998_s3, %s2999_s16  }
 0x3ba PF: > { %s2176_s18 = sand.u32 1, %s2967_s21   ;;  %p2605_p5 = pnand %p2317_p11, %p3080_p6 }
 0x3bb   : > { %s2177_s19 = scalar_lea.sflag [#allocation7], %s2176_s18 }
 0x3bc   : > { %p2606_p9 = pneg %p2605_p5 }
 0x3be   : > { %2962 = dma.done.wait (%p2606_p9), %s2177_s19, 2048  }
 0x3bf   : > { %2964 = vsyncadd (%p2606_p9), %s2177_s19, 4294965248  ;;  %s21_s26 = sadd.s32 1, %s2987_s26   ;;  %s3896_s8 = sld [smem:[#allocation17_spill]] }
 0x3c0   : > { %p18_p2 = scmp.ge.s32.totalorder %s21_s26, 4   ;;  %s3897_s21 = smov %s2971_s22 }
 0x3c1   : > { %s3898_s22 = smov %s2975_s23  ;;  %s3899_s23 = smov %s3124_s14 }
 0x3c2   : > { %s3900_s24 = smov %s2983_s25  ;;  %20 = sbr.rel (!%p18_p2) target bundleno = 9 (0x9), region = 115 }
 0x3c5   : > { %s3901_s25 = smov %s3896_s8 }
 0x3c7   :  { %2183 = vsyncpa [#allocation6], 1 }
 0x3c8   :  { %2185 = vsyncpa [#allocation6 + $0x1], 1 }
 0x3c9   :  { %2186 = vsyncpa [#allocation9], 1 }
 0x3ca   :  { %2187 = vsyncpa [#allocation7], 1 }
 0x3cb   :  { %2189 = vsyncpa [#allocation7 + $0x1], 1 }

</bundles_post_ra>
